<compile_context>
chip_gen: v5e
topology: v5e:2x2
jax: 0.10.0
libtpu: 0.0.40
codegen_flags: <defaults>
</compile_context>

<pallas_src>
import functools
import math

import numpy as np
import jax
import jax.numpy as jnp
from jax import lax
from jax.experimental import pallas as pl
from jax.experimental.pallas import tpu as pltpu


# ------------------------------ host-side helpers ---------------------------

def _round_up(x, m):
    return ((x + m - 1) // m) * m


def _up1d(n):
    """(2n, n) matrix reproducing torch Upsample(scale=2, bilinear, ac=False)."""
    m = np.zeros((2 * n, n), np.float32)
    for k in range(n):
        m[2 * k, max(k - 1, 0)] += 0.25
        m[2 * k, k] += 0.75
        m[2 * k + 1, k] += 0.75
        m[2 * k + 1, min(k + 1, n - 1)] += 0.25
    return m


def _upsample_op(h1, w1, pw, width):
    """(h1*w1, width) operator: flat (h1,w1) image -> bilinear x2 image laid
    out at the top-left of a `pw`-stride flattened frame, zeros elsewhere."""
    uh, uw = _up1d(h1), _up1d(w1)
    op = np.zeros((h1 * w1, width), np.float32)
    for yy in range(2 * h1):
        for xx in range(2 * w1):
            op[:, yy * pw + xx] = np.outer(uh[yy], uw[xx]).reshape(-1)
    return jnp.asarray(op)


def _valid_mask(h, w, pw, width):
    """(1, width) mask: 1 at frame positions y*pw+x with y<h, x<w, else 0."""
    m = np.zeros((1, width), np.float32)
    for y in range(h):
        m[0, y * pw:y * pw + w] = 1.0
    return jnp.asarray(m)


def _tapify(w):
    """(Cout, Cin, 3, 3) -> (9, Cout, Cin); tap index t = i*3 + j."""
    co, ci, kh, kw = w.shape
    return jnp.transpose(w, (2, 3, 0, 1)).reshape(kh * kw, co, ci)


# --------------------------------- the kernel --------------------------------

def _up_res_kernel(x1_ref, x2_ref, up_op_ref,
                   w1_ref, b1_ref, w2a_ref, w2b_ref, b2_ref, w3_ref, b3_ref,
                   m1_ref, m2_ref, o_ref, *, pw, L, pad, off_a, off_b):
    f32 = jnp.float32
    mm = lambda a, b: jnp.dot(a, b, preferred_element_type=f32)

    co1 = w1_ref.shape[1]
    co2 = w2a_ref.shape[1]
    co3 = w3_ref.shape[1]

    # ---- bilinear x2 upsample, emitted straight into the pw-stride frame ----
    up = mm(x1_ref[...], up_op_ref[...])                       # (C1, BW)

    # ---- up_res.conv1: 3x3 valid conv, 9-tap accumulation --------------------
    acc = jnp.zeros((co1, L), f32)
    for i in range(3):
        for j in range(3):
            d = i * pw + j
            acc = acc + mm(w1_ref[i * 3 + j], up[:, d:d + L])
    out1 = (acc + b1_ref[...]) * m1_ref[...]                   # mask junk lanes

    # F.pad shift + resconv2.conv1's own zero padding become a constant lane
    # offset (off_a) into a zero-extended buffer.
    z1 = jnp.zeros((co1, pad), f32)
    buf_a = jnp.concatenate([z1, out1, z1], axis=1)            # (co1, 2*pad+L)

    # ---- resconv2.conv1 on cat([x2, x1]) + relu ------------------------------
    x2v = x2_ref[...]                                          # (C2, BW), pre-padded frame
    acc = jnp.zeros((co2, L), f32)
    for i in range(3):
        for j in range(3):
            t = i * 3 + j
            d = i * pw + j
            acc = acc + mm(w2a_ref[t], x2v[:, d:d + L])
            acc = acc + mm(w2b_ref[t],
                           buf_a[:, pad - off_a + d:pad - off_a + d + L])
    out2 = jnp.maximum(acc + b2_ref[...], 0.0) * m2_ref[...]

    z2 = jnp.zeros((co2, pad), f32)
    buf_b = jnp.concatenate([z2, out2, z2], axis=1)            # (co2, 2*pad+L)

    # ---- resconv2.conv2 + relu ----------------------------------------------
    acc = jnp.zeros((co3, L), f32)
    for i in range(3):
        for j in range(3):
            t = i * 3 + j
            d = i * pw + j
            acc = acc + mm(w3_ref[t],
                           buf_b[:, pad - off_b + d:pad - off_b + d + L])
    o_ref[...] = jnp.maximum(acc + b3_ref[...], 0.0)


# ------------------------------- forward wrapper -----------------------------

def up_res_forward(params, x1, x2):
    n, c1, h1, w1 = x1.shape
    n2, c2, h2, w2 = x2.shape
    assert n == n2

    hu, wu = 2 * h1, 2 * w1            # after bilinear x2
    hc, wc = hu - 2, wu - 2            # after 3x3 valid conv
    dy, dx = h2 - hc, w2 - wc
    pt, plf = dy // 2, dx // 2         # F.pad top / left (bottom/right implicit)
    ph, pw = h2 + 2, w2 + 2            # zero-padded frame for the 3x3 pad=1 convs
    maxd = 2 * pw + 2                  # largest tap offset
    L = _round_up(ph * pw, 128)        # lane width of all conv outputs
    bw = _round_up(L + maxd, 128)      # lane width of upsample / x2 frames
    off_a = (1 + pt) * pw + (1 + plf)  # F.pad + conv2 padding shift
    off_b = pw + 1                     # conv3 padding shift
    pad = _round_up(max(off_a, off_b, maxd), 128)

    co1 = params["up_conv1_w"].shape[0]
    co2 = params["rc_conv1_w"].shape[0]
    co3 = params["rc_conv2_w"].shape[0]

    # host-side layout prep (one cheap pad/reshape per input, constants otherwise)
    x1f = x1.reshape(n, c1, h1 * w1)
    x2p = jnp.pad(x2, ((0, 0), (0, 0), (1, 1), (1, 1))).reshape(n, c2, ph * pw)
    x2p = jnp.pad(x2p, ((0, 0), (0, 0), (0, bw - ph * pw)))

    up_op = _upsample_op(h1, w1, pw, bw)
    m1 = _valid_mask(hc, wc, pw, L)
    m2 = _valid_mask(h2, w2, pw, L)

    w1t = _tapify(params["up_conv1_w"])
    w2t = _tapify(params["rc_conv1_w"])
    w2a, w2b = w2t[:, :, :c2], w2t[:, :, c2:]          # cat order: [x2, x1]
    w3t = _tapify(params["rc_conv2_w"])
    b1 = params["up_conv1_b"].reshape(co1, 1)
    b2 = params["rc_conv1_b"].reshape(co2, 1)
    b3 = params["rc_conv2_b"].reshape(co3, 1)

    kernel = functools.partial(_up_res_kernel, pw=pw, L=L, pad=pad,
                               off_a=off_a, off_b=off_b)

    def full(*shape):
        return pl.BlockSpec(shape, lambda nb: (0,) * len(shape))

    out = pl.pallas_call(
        kernel,
        out_shape=jax.ShapeDtypeStruct((n, co3, L), jnp.float32),
        grid=(n,),
        in_specs=[
            pl.BlockSpec((None, c1, h1 * w1), lambda nb: (nb, 0, 0)),   # x1 (flat)
            pl.BlockSpec((None, c2, bw), lambda nb: (nb, 0, 0)),        # x2 (framed)
            full(h1 * w1, bw),                                          # upsample op
            full(9, co1, c1), full(co1, 1),                             # conv1 w,b
            full(9, co2, c2), full(9, co2, co1), full(co2, 1),          # rc.conv1 w,b
            full(9, co3, co2), full(co3, 1),                            # rc.conv2 w,b
            full(1, L), full(1, L),                                     # masks
        ],
        out_specs=pl.BlockSpec((None, co3, L), lambda nb: (nb, 0, 0)),
        compiler_params=pltpu.CompilerParams(
            dimension_semantics=("parallel",)),
    )(x1f, x2p, up_op, w1t, b1, w2a, w2b, b2, w3t, b3, m1, m2)

    # strip frame padding / junk lanes -> NCHW
    out = out[:, :, :ph * pw].reshape(n, co3, ph, pw)[:, :, :h2, :w2]
    return out


# --------------------------- pure-JAX reference check ------------------------

def _reference_forward(params, x1, x2):
    hp = lax.Precision.HIGHEST
    h1, w1 = x1.shape[2], x1.shape[3]
    uh = jnp.asarray(_up1d(h1))
    uw = jnp.asarray(_up1d(w1))
    up = jnp.einsum("Yh,nchw,Xw->ncYX", uh, x1, uw, precision=hp)

    def conv(x, w, b, p):
        y = lax.conv_general_dilated(
            x, w, (1, 1), ((p, p), (p, p)),
            dimension_numbers=("NCHW", "OIHW", "NCHW"), precision=hp)
        return y + b[None, :, None, None]

    y1 = conv(up, params["up_conv1_w"], params["up_conv1_b"], 0)
    dy = x2.shape[2] - y1.shape[2]
    dx = x2.shape[3] - y1.shape[3]
    y1 = jnp.pad(y1, ((0, 0), (0, 0),
                      (dy // 2, dy - dy // 2), (dx // 2, dx - dx // 2)))
    xc = jnp.concatenate([x2, y1], axis=1)
    r = jax.nn.relu(conv(xc, params["rc_conv1_w"], params["rc_conv1_b"], 1))
    r = jax.nn.relu(conv(r, params["rc_conv2_w"], params["rc_conv2_b"], 1))
    return r


# ------------------------------------ main ------------------------------------

if __name__ == "__main__":
    # up_res(up_in_ch=4, up_out_ch=4, cat_in_ch=8, cat_out_ch=4, if_convt=False)
    up_in_ch, up_out_ch = 4, 4
    cat_in_ch, cat_out_ch = 8, 4

    key = jax.random.PRNGKey(0)
    keys = jax.random.split(key, 8)

    x1 = jax.random.normal(keys[0], (2, up_in_ch, 8, 8), dtype=jnp.float32)
    x2 = jax.random.normal(keys[1], (2, 4, 16, 16), dtype=jnp.float32)

    def init_conv(k, cout, cin, kh, kw):
        scale = 1.0 / math.sqrt(cin * kh * kw)
        kw_, kb_ = jax.random.split(k)
        w = jax.random.uniform(kw_, (cout, cin, kh, kw), jnp.float32, -scale, scale)
        b = jax.random.uniform(kb_, (cout,), jnp.float32, -scale, scale)
        return w, b

    params = {}
    params["up_conv1_w"], params["up_conv1_b"] = init_conv(keys[2], up_out_ch, up_in_ch, 3, 3)
    params["rc_conv1_w"], params["rc_conv1_b"] = init_conv(keys[3], cat_out_ch, cat_in_ch, 3, 3)
    params["rc_conv2_w"], params["rc_conv2_b"] = init_conv(keys[4], cat_out_ch, cat_out_ch, 3, 3)
    # TODO(synk): resconv2.red (1x1 conv) and the residual add never reach the
    # returned tensor (resconv2.forward returns rx), so they are not computed.

    out = jax.jit(up_res_forward)(params, x1, x2)
    out = jax.block_until_ready(out)

    assert out.shape == (2, cat_out_ch, 16, 16), out.shape
    assert bool(jnp.all(jnp.isfinite(out)))

    ref = _reference_forward(params, x1, x2)
    err = float(jnp.max(jnp.abs(out - ref)))
    assert err < 2e-2, f"mismatch vs reference: {err}"

    print("KERNEL_OK")
</pallas_src>

<mosaic_0001>
module attributes {stable_mosaic.version = 11 : i64} {
  func.func @_up_res_kernel(%arg0: i32, %arg1: memref<1x4x64xf32, #tpu.memory_space<vmem>>, %arg2: memref<1x4x512xf32, #tpu.memory_space<vmem>>, %arg3: memref<64x512xf32, #tpu.memory_space<vmem>>, %arg4: memref<9x4x4xf32, #tpu.memory_space<vmem>>, %arg5: memref<4x1xf32, #tpu.memory_space<vmem>>, %arg6: memref<9x4x4xf32, #tpu.memory_space<vmem>>, %arg7: memref<9x4x4xf32, #tpu.memory_space<vmem>>, %arg8: memref<4x1xf32, #tpu.memory_space<vmem>>, %arg9: memref<9x4x4xf32, #tpu.memory_space<vmem>>, %arg10: memref<4x1xf32, #tpu.memory_space<vmem>>, %arg11: memref<1x384xf32, #tpu.memory_space<vmem>>, %arg12: memref<1x384xf32, #tpu.memory_space<vmem>>, %arg13: memref<1x4x384xf32, #tpu.memory_space<vmem>>) attributes {dimension_semantics = [#tpu.dimension_semantics<parallel>], iteration_bounds = array<i64: 2>, scalar_prefetch = 0 : i64, scratch_operands = 0 : i64, tpu.core_type = #tpu.core_type<tc>, window_params = [{transform_indices = @transform_0, window_bounds = array<i64: 1, 4, 64>}, {transform_indices = @transform_1, window_bounds = array<i64: 1, 4, 512>}, {pipeline_mode = #tpu.pipeline_mode<synchronous>, transform_indices = @transform_2, window_bounds = array<i64: 64, 512>}, {pipeline_mode = #tpu.pipeline_mode<synchronous>, transform_indices = @transform_3, window_bounds = array<i64: 9, 4, 4>}, {pipeline_mode = #tpu.pipeline_mode<synchronous>, transform_indices = @transform_4, window_bounds = array<i64: 4, 1>}, {pipeline_mode = #tpu.pipeline_mode<synchronous>, transform_indices = @transform_5, window_bounds = array<i64: 9, 4, 4>}, {pipeline_mode = #tpu.pipeline_mode<synchronous>, transform_indices = @transform_6, window_bounds = array<i64: 9, 4, 4>}, {pipeline_mode = #tpu.pipeline_mode<synchronous>, transform_indices = @transform_7, window_bounds = array<i64: 4, 1>}, {pipeline_mode = #tpu.pipeline_mode<synchronous>, transform_indices = @transform_8, window_bounds = array<i64: 9, 4, 4>}, {pipeline_mode = #tpu.pipeline_mode<synchronous>, transform_indices = @transform_9, window_bounds = array<i64: 4, 1>}, {pipeline_mode = #tpu.pipeline_mode<synchronous>, transform_indices = @transform_10, window_bounds = array<i64: 1, 384>}, {pipeline_mode = #tpu.pipeline_mode<synchronous>, transform_indices = @transform_11, window_bounds = array<i64: 1, 384>}, {transform_indices = @transform_12, window_bounds = array<i64: 1, 4, 384>}]} {
    %c0 = arith.constant 0 : index
    %c0_0 = arith.constant 0 : index
    %c0_1 = arith.constant 0 : index
    %0 = vector.load %arg1[%c0, %c0_0, %c0_1] : memref<1x4x64xf32, #tpu.memory_space<vmem>>, vector<1x4x64xf32>
    %1 = vector.shape_cast %0 : vector<1x4x64xf32> to vector<4x64xf32>
    %c0_2 = arith.constant 0 : index
    %c0_3 = arith.constant 0 : index
    %2 = vector.load %arg3[%c0_2, %c0_3] : memref<64x512xf32, #tpu.memory_space<vmem>>, vector<64x512xf32>
    %cst = arith.constant dense<0.000000e+00> : vector<4x512xf32>
    %3 = tpu.matmul %1, %2, %cst {dimension_numbers = #tpu.dot_dimension_numbers<[1], [0], [0], [1], [0, 0, 1, 1], [], []>} : vector<4x64xf32>, vector<64x512xf32>, vector<4x512xf32> -> vector<4x512xf32>
    %cst_4 = arith.constant 0.000000e+00 : f32
    %4 = vector.broadcast %cst_4 : f32 to vector<4x384xf32>
    %c0_5 = arith.constant 0 : index
    %c0_6 = arith.constant 0 : index
    %c0_7 = arith.constant 0 : index
    %5 = vector.load %arg4[%c0_5, %c0_6, %c0_7] : memref<9x4x4xf32, #tpu.memory_space<vmem>>, vector<1x4x4xf32>
    %6 = vector.shape_cast %5 : vector<1x4x4xf32> to vector<4x4xf32>
    %7 = vector.extract_strided_slice %3 {offsets = [0, 0], sizes = [4, 384], strides = [1, 1]} : vector<4x512xf32> to vector<4x384xf32>
    %cst_8 = arith.constant dense<0.000000e+00> : vector<4x384xf32>
    %8 = tpu.matmul %6, %7, %cst_8 {dimension_numbers = #tpu.dot_dimension_numbers<[1], [0], [0], [1], [0, 0, 1, 1], [], []>} : vector<4x4xf32>, vector<4x384xf32>, vector<4x384xf32> -> vector<4x384xf32>
    %9 = arith.addf %4, %8 : vector<4x384xf32>
    %c1 = arith.constant 1 : index
    %c0_9 = arith.constant 0 : index
    %c0_10 = arith.constant 0 : index
    %10 = vector.load %arg4[%c1, %c0_9, %c0_10] : memref<9x4x4xf32, #tpu.memory_space<vmem>>, vector<1x4x4xf32>
    %11 = vector.shape_cast %10 : vector<1x4x4xf32> to vector<4x4xf32>
    %12 = vector.extract_strided_slice %3 {offsets = [0, 1], sizes = [4, 384], strides = [1, 1]} : vector<4x512xf32> to vector<4x384xf32>
    %cst_11 = arith.constant dense<0.000000e+00> : vector<4x384xf32>
    %13 = tpu.matmul %11, %12, %cst_11 {dimension_numbers = #tpu.dot_dimension_numbers<[1], [0], [0], [1], [0, 0, 1, 1], [], []>} : vector<4x4xf32>, vector<4x384xf32>, vector<4x384xf32> -> vector<4x384xf32>
    %14 = arith.addf %9, %13 : vector<4x384xf32>
    %c2 = arith.constant 2 : index
    %c0_12 = arith.constant 0 : index
    %c0_13 = arith.constant 0 : index
    %15 = vector.load %arg4[%c2, %c0_12, %c0_13] : memref<9x4x4xf32, #tpu.memory_space<vmem>>, vector<1x4x4xf32>
    %16 = vector.shape_cast %15 : vector<1x4x4xf32> to vector<4x4xf32>
    %17 = vector.extract_strided_slice %3 {offsets = [0, 2], sizes = [4, 384], strides = [1, 1]} : vector<4x512xf32> to vector<4x384xf32>
    %cst_14 = arith.constant dense<0.000000e+00> : vector<4x384xf32>
    %18 = tpu.matmul %16, %17, %cst_14 {dimension_numbers = #tpu.dot_dimension_numbers<[1], [0], [0], [1], [0, 0, 1, 1], [], []>} : vector<4x4xf32>, vector<4x384xf32>, vector<4x384xf32> -> vector<4x384xf32>
    %19 = arith.addf %14, %18 : vector<4x384xf32>
    %c3 = arith.constant 3 : index
    %c0_15 = arith.constant 0 : index
    %c0_16 = arith.constant 0 : index
    %20 = vector.load %arg4[%c3, %c0_15, %c0_16] : memref<9x4x4xf32, #tpu.memory_space<vmem>>, vector<1x4x4xf32>
    %21 = vector.shape_cast %20 : vector<1x4x4xf32> to vector<4x4xf32>
    %22 = vector.extract_strided_slice %3 {offsets = [0, 18], sizes = [4, 384], strides = [1, 1]} : vector<4x512xf32> to vector<4x384xf32>
    %cst_17 = arith.constant dense<0.000000e+00> : vector<4x384xf32>
    %23 = tpu.matmul %21, %22, %cst_17 {dimension_numbers = #tpu.dot_dimension_numbers<[1], [0], [0], [1], [0, 0, 1, 1], [], []>} : vector<4x4xf32>, vector<4x384xf32>, vector<4x384xf32> -> vector<4x384xf32>
    %24 = arith.addf %19, %23 : vector<4x384xf32>
    %c4 = arith.constant 4 : index
    %c0_18 = arith.constant 0 : index
    %c0_19 = arith.constant 0 : index
    %25 = vector.load %arg4[%c4, %c0_18, %c0_19] : memref<9x4x4xf32, #tpu.memory_space<vmem>>, vector<1x4x4xf32>
    %26 = vector.shape_cast %25 : vector<1x4x4xf32> to vector<4x4xf32>
    %27 = vector.extract_strided_slice %3 {offsets = [0, 19], sizes = [4, 384], strides = [1, 1]} : vector<4x512xf32> to vector<4x384xf32>
    %cst_20 = arith.constant dense<0.000000e+00> : vector<4x384xf32>
    %28 = tpu.matmul %26, %27, %cst_20 {dimension_numbers = #tpu.dot_dimension_numbers<[1], [0], [0], [1], [0, 0, 1, 1], [], []>} : vector<4x4xf32>, vector<4x384xf32>, vector<4x384xf32> -> vector<4x384xf32>
    %29 = arith.addf %24, %28 : vector<4x384xf32>
    %c5 = arith.constant 5 : index
    %c0_21 = arith.constant 0 : index
    %c0_22 = arith.constant 0 : index
    %30 = vector.load %arg4[%c5, %c0_21, %c0_22] : memref<9x4x4xf32, #tpu.memory_space<vmem>>, vector<1x4x4xf32>
    %31 = vector.shape_cast %30 : vector<1x4x4xf32> to vector<4x4xf32>
    %32 = vector.extract_strided_slice %3 {offsets = [0, 20], sizes = [4, 384], strides = [1, 1]} : vector<4x512xf32> to vector<4x384xf32>
    %cst_23 = arith.constant dense<0.000000e+00> : vector<4x384xf32>
    %33 = tpu.matmul %31, %32, %cst_23 {dimension_numbers = #tpu.dot_dimension_numbers<[1], [0], [0], [1], [0, 0, 1, 1], [], []>} : vector<4x4xf32>, vector<4x384xf32>, vector<4x384xf32> -> vector<4x384xf32>
    %34 = arith.addf %29, %33 : vector<4x384xf32>
    %c6 = arith.constant 6 : index
    %c0_24 = arith.constant 0 : index
    %c0_25 = arith.constant 0 : index
    %35 = vector.load %arg4[%c6, %c0_24, %c0_25] : memref<9x4x4xf32, #tpu.memory_space<vmem>>, vector<1x4x4xf32>
    %36 = vector.shape_cast %35 : vector<1x4x4xf32> to vector<4x4xf32>
    %37 = vector.extract_strided_slice %3 {offsets = [0, 36], sizes = [4, 384], strides = [1, 1]} : vector<4x512xf32> to vector<4x384xf32>
    %cst_26 = arith.constant dense<0.000000e+00> : vector<4x384xf32>
    %38 = tpu.matmul %36, %37, %cst_26 {dimension_numbers = #tpu.dot_dimension_numbers<[1], [0], [0], [1], [0, 0, 1, 1], [], []>} : vector<4x4xf32>, vector<4x384xf32>, vector<4x384xf32> -> vector<4x384xf32>
    %39 = arith.addf %34, %38 : vector<4x384xf32>
    %c7 = arith.constant 7 : index
    %c0_27 = arith.constant 0 : index
    %c0_28 = arith.constant 0 : index
    %40 = vector.load %arg4[%c7, %c0_27, %c0_28] : memref<9x4x4xf32, #tpu.memory_space<vmem>>, vector<1x4x4xf32>
    %41 = vector.shape_cast %40 : vector<1x4x4xf32> to vector<4x4xf32>
    %42 = vector.extract_strided_slice %3 {offsets = [0, 37], sizes = [4, 384], strides = [1, 1]} : vector<4x512xf32> to vector<4x384xf32>
    %cst_29 = arith.constant dense<0.000000e+00> : vector<4x384xf32>
    %43 = tpu.matmul %41, %42, %cst_29 {dimension_numbers = #tpu.dot_dimension_numbers<[1], [0], [0], [1], [0, 0, 1, 1], [], []>} : vector<4x4xf32>, vector<4x384xf32>, vector<4x384xf32> -> vector<4x384xf32>
    %44 = arith.addf %39, %43 : vector<4x384xf32>
    %c8 = arith.constant 8 : index
    %c0_30 = arith.constant 0 : index
    %c0_31 = arith.constant 0 : index
    %45 = vector.load %arg4[%c8, %c0_30, %c0_31] : memref<9x4x4xf32, #tpu.memory_space<vmem>>, vector<1x4x4xf32>
    %46 = vector.shape_cast %45 : vector<1x4x4xf32> to vector<4x4xf32>
    %47 = vector.extract_strided_slice %3 {offsets = [0, 38], sizes = [4, 384], strides = [1, 1]} : vector<4x512xf32> to vector<4x384xf32>
    %cst_32 = arith.constant dense<0.000000e+00> : vector<4x384xf32>
    %48 = tpu.matmul %46, %47, %cst_32 {dimension_numbers = #tpu.dot_dimension_numbers<[1], [0], [0], [1], [0, 0, 1, 1], [], []>} : vector<4x4xf32>, vector<4x384xf32>, vector<4x384xf32> -> vector<4x384xf32>
    %49 = arith.addf %44, %48 : vector<4x384xf32>
    %c0_33 = arith.constant 0 : index
    %c0_34 = arith.constant 0 : index
    %50 = vector.load %arg5[%c0_33, %c0_34] : memref<4x1xf32, #tpu.memory_space<vmem>>, vector<4x1xf32>
    %51 = vector.broadcast %50 : vector<4x1xf32> to vector<4x384xf32>
    %52 = arith.addf %49, %51 : vector<4x384xf32>
    %c0_35 = arith.constant 0 : index
    %c0_36 = arith.constant 0 : index
    %53 = vector.load %arg11[%c0_35, %c0_36] : memref<1x384xf32, #tpu.memory_space<vmem>>, vector<1x384xf32>
    %54 = vector.broadcast %53 : vector<1x384xf32> to vector<4x384xf32>
    %55 = arith.mulf %52, %54 : vector<4x384xf32>
    %cst_37 = arith.constant 0.000000e+00 : f32
    %56 = vector.broadcast %cst_37 : f32 to vector<4x128xf32>
    %57 = tpu.concatenate %56, %55, %56 in 1 : vector<4x128xf32>, vector<4x384xf32>, vector<4x128xf32> -> vector<4x640xf32>
    %c0_38 = arith.constant 0 : index
    %c0_39 = arith.constant 0 : index
    %c0_40 = arith.constant 0 : index
    %58 = vector.load %arg2[%c0_38, %c0_39, %c0_40] : memref<1x4x512xf32, #tpu.memory_space<vmem>>, vector<1x4x512xf32>
    %59 = vector.shape_cast %58 : vector<1x4x512xf32> to vector<4x512xf32>
    %cst_41 = arith.constant 0.000000e+00 : f32
    %60 = vector.broadcast %cst_41 : f32 to vector<4x384xf32>
    %c0_42 = arith.constant 0 : index
    %c0_43 = arith.constant 0 : index
    %c0_44 = arith.constant 0 : index
    %61 = vector.load %arg6[%c0_42, %c0_43, %c0_44] : memref<9x4x4xf32, #tpu.memory_space<vmem>>, vector<1x4x4xf32>
    %62 = vector.shape_cast %61 : vector<1x4x4xf32> to vector<4x4xf32>
    %63 = vector.extract_strided_slice %59 {offsets = [0, 0], sizes = [4, 384], strides = [1, 1]} : vector<4x512xf32> to vector<4x384xf32>
    %cst_45 = arith.constant dense<0.000000e+00> : vector<4x384xf32>
    %64 = tpu.matmul %62, %63, %cst_45 {dimension_numbers = #tpu.dot_dimension_numbers<[1], [0], [0], [1], [0, 0, 1, 1], [], []>} : vector<4x4xf32>, vector<4x384xf32>, vector<4x384xf32> -> vector<4x384xf32>
    %65 = arith.addf %60, %64 : vector<4x384xf32>
    %c0_46 = arith.constant 0 : index
    %c0_47 = arith.constant 0 : index
    %c0_48 = arith.constant 0 : index
    %66 = vector.load %arg7[%c0_46, %c0_47, %c0_48] : memref<9x4x4xf32, #tpu.memory_space<vmem>>, vector<1x4x4xf32>
    %67 = vector.shape_cast %66 : vector<1x4x4xf32> to vector<4x4xf32>
    %68 = vector.extract_strided_slice %57 {offsets = [0, 90], sizes = [4, 384], strides = [1, 1]} : vector<4x640xf32> to vector<4x384xf32>
    %cst_49 = arith.constant dense<0.000000e+00> : vector<4x384xf32>
    %69 = tpu.matmul %67, %68, %cst_49 {dimension_numbers = #tpu.dot_dimension_numbers<[1], [0], [0], [1], [0, 0, 1, 1], [], []>} : vector<4x4xf32>, vector<4x384xf32>, vector<4x384xf32> -> vector<4x384xf32>
    %70 = arith.addf %65, %69 : vector<4x384xf32>
    %c1_50 = arith.constant 1 : index
    %c0_51 = arith.constant 0 : index
    %c0_52 = arith.constant 0 : index
    %71 = vector.load %arg6[%c1_50, %c0_51, %c0_52] : memref<9x4x4xf32, #tpu.memory_space<vmem>>, vector<1x4x4xf32>
    %72 = vector.shape_cast %71 : vector<1x4x4xf32> to vector<4x4xf32>
    %73 = vector.extract_strided_slice %59 {offsets = [0, 1], sizes = [4, 384], strides = [1, 1]} : vector<4x512xf32> to vector<4x384xf32>
    %cst_53 = arith.constant dense<0.000000e+00> : vector<4x384xf32>
    %74 = tpu.matmul %72, %73, %cst_53 {dimension_numbers = #tpu.dot_dimension_numbers<[1], [0], [0], [1], [0, 0, 1, 1], [], []>} : vector<4x4xf32>, vector<4x384xf32>, vector<4x384xf32> -> vector<4x384xf32>
    %75 = arith.addf %70, %74 : vector<4x384xf32>
    %c1_54 = arith.constant 1 : index
    %c0_55 = arith.constant 0 : index
    %c0_56 = arith.constant 0 : index
    %76 = vector.load %arg7[%c1_54, %c0_55, %c0_56] : memref<9x4x4xf32, #tpu.memory_space<vmem>>, vector<1x4x4xf32>
    %77 = vector.shape_cast %76 : vector<1x4x4xf32> to vector<4x4xf32>
    %78 = vector.extract_strided_slice %57 {offsets = [0, 91], sizes = [4, 384], strides = [1, 1]} : vector<4x640xf32> to vector<4x384xf32>
    %cst_57 = arith.constant dense<0.000000e+00> : vector<4x384xf32>
    %79 = tpu.matmul %77, %78, %cst_57 {dimension_numbers = #tpu.dot_dimension_numbers<[1], [0], [0], [1], [0, 0, 1, 1], [], []>} : vector<4x4xf32>, vector<4x384xf32>, vector<4x384xf32> -> vector<4x384xf32>
    %80 = arith.addf %75, %79 : vector<4x384xf32>
    %c2_58 = arith.constant 2 : index
    %c0_59 = arith.constant 0 : index
    %c0_60 = arith.constant 0 : index
    %81 = vector.load %arg6[%c2_58, %c0_59, %c0_60] : memref<9x4x4xf32, #tpu.memory_space<vmem>>, vector<1x4x4xf32>
    %82 = vector.shape_cast %81 : vector<1x4x4xf32> to vector<4x4xf32>
    %83 = vector.extract_strided_slice %59 {offsets = [0, 2], sizes = [4, 384], strides = [1, 1]} : vector<4x512xf32> to vector<4x384xf32>
    %cst_61 = arith.constant dense<0.000000e+00> : vector<4x384xf32>
    %84 = tpu.matmul %82, %83, %cst_61 {dimension_numbers = #tpu.dot_dimension_numbers<[1], [0], [0], [1], [0, 0, 1, 1], [], []>} : vector<4x4xf32>, vector<4x384xf32>, vector<4x384xf32> -> vector<4x384xf32>
    %85 = arith.addf %80, %84 : vector<4x384xf32>
    %c2_62 = arith.constant 2 : index
    %c0_63 = arith.constant 0 : index
    %c0_64 = arith.constant 0 : index
    %86 = vector.load %arg7[%c2_62, %c0_63, %c0_64] : memref<9x4x4xf32, #tpu.memory_space<vmem>>, vector<1x4x4xf32>
    %87 = vector.shape_cast %86 : vector<1x4x4xf32> to vector<4x4xf32>
    %88 = vector.extract_strided_slice %57 {offsets = [0, 92], sizes = [4, 384], strides = [1, 1]} : vector<4x640xf32> to vector<4x384xf32>
    %cst_65 = arith.constant dense<0.000000e+00> : vector<4x384xf32>
    %89 = tpu.matmul %87, %88, %cst_65 {dimension_numbers = #tpu.dot_dimension_numbers<[1], [0], [0], [1], [0, 0, 1, 1], [], []>} : vector<4x4xf32>, vector<4x384xf32>, vector<4x384xf32> -> vector<4x384xf32>
    %90 = arith.addf %85, %89 : vector<4x384xf32>
    %c3_66 = arith.constant 3 : index
    %c0_67 = arith.constant 0 : index
    %c0_68 = arith.constant 0 : index
    %91 = vector.load %arg6[%c3_66, %c0_67, %c0_68] : memref<9x4x4xf32, #tpu.memory_space<vmem>>, vector<1x4x4xf32>
    %92 = vector.shape_cast %91 : vector<1x4x4xf32> to vector<4x4xf32>
    %93 = vector.extract_strided_slice %59 {offsets = [0, 18], sizes = [4, 384], strides = [1, 1]} : vector<4x512xf32> to vector<4x384xf32>
    %cst_69 = arith.constant dense<0.000000e+00> : vector<4x384xf32>
    %94 = tpu.matmul %92, %93, %cst_69 {dimension_numbers = #tpu.dot_dimension_numbers<[1], [0], [0], [1], [0, 0, 1, 1], [], []>} : vector<4x4xf32>, vector<4x384xf32>, vector<4x384xf32> -> vector<4x384xf32>
    %95 = arith.addf %90, %94 : vector<4x384xf32>
    %c3_70 = arith.constant 3 : index
    %c0_71 = arith.constant 0 : index
    %c0_72 = arith.constant 0 : index
    %96 = vector.load %arg7[%c3_70, %c0_71, %c0_72] : memref<9x4x4xf32, #tpu.memory_space<vmem>>, vector<1x4x4xf32>
    %97 = vector.shape_cast %96 : vector<1x4x4xf32> to vector<4x4xf32>
    %98 = vector.extract_strided_slice %57 {offsets = [0, 108], sizes = [4, 384], strides = [1, 1]} : vector<4x640xf32> to vector<4x384xf32>
    %cst_73 = arith.constant dense<0.000000e+00> : vector<4x384xf32>
    %99 = tpu.matmul %97, %98, %cst_73 {dimension_numbers = #tpu.dot_dimension_numbers<[1], [0], [0], [1], [0, 0, 1, 1], [], []>} : vector<4x4xf32>, vector<4x384xf32>, vector<4x384xf32> -> vector<4x384xf32>
    %100 = arith.addf %95, %99 : vector<4x384xf32>
    %c4_74 = arith.constant 4 : index
    %c0_75 = arith.constant 0 : index
    %c0_76 = arith.constant 0 : index
    %101 = vector.load %arg6[%c4_74, %c0_75, %c0_76] : memref<9x4x4xf32, #tpu.memory_space<vmem>>, vector<1x4x4xf32>
    %102 = vector.shape_cast %101 : vector<1x4x4xf32> to vector<4x4xf32>
    %103 = vector.extract_strided_slice %59 {offsets = [0, 19], sizes = [4, 384], strides = [1, 1]} : vector<4x512xf32> to vector<4x384xf32>
    %cst_77 = arith.constant dense<0.000000e+00> : vector<4x384xf32>
    %104 = tpu.matmul %102, %103, %cst_77 {dimension_numbers = #tpu.dot_dimension_numbers<[1], [0], [0], [1], [0, 0, 1, 1], [], []>} : vector<4x4xf32>, vector<4x384xf32>, vector<4x384xf32> -> vector<4x384xf32>
    %105 = arith.addf %100, %104 : vector<4x384xf32>
    %c4_78 = arith.constant 4 : index
    %c0_79 = arith.constant 0 : index
    %c0_80 = arith.constant 0 : index
    %106 = vector.load %arg7[%c4_78, %c0_79, %c0_80] : memref<9x4x4xf32, #tpu.memory_space<vmem>>, vector<1x4x4xf32>
    %107 = vector.shape_cast %106 : vector<1x4x4xf32> to vector<4x4xf32>
    %108 = vector.extract_strided_slice %57 {offsets = [0, 109], sizes = [4, 384], strides = [1, 1]} : vector<4x640xf32> to vector<4x384xf32>
    %cst_81 = arith.constant dense<0.000000e+00> : vector<4x384xf32>
    %109 = tpu.matmul %107, %108, %cst_81 {dimension_numbers = #tpu.dot_dimension_numbers<[1], [0], [0], [1], [0, 0, 1, 1], [], []>} : vector<4x4xf32>, vector<4x384xf32>, vector<4x384xf32> -> vector<4x384xf32>
    %110 = arith.addf %105, %109 : vector<4x384xf32>
    %c5_82 = arith.constant 5 : index
    %c0_83 = arith.constant 0 : index
    %c0_84 = arith.constant 0 : index
    %111 = vector.load %arg6[%c5_82, %c0_83, %c0_84] : memref<9x4x4xf32, #tpu.memory_space<vmem>>, vector<1x4x4xf32>
    %112 = vector.shape_cast %111 : vector<1x4x4xf32> to vector<4x4xf32>
    %113 = vector.extract_strided_slice %59 {offsets = [0, 20], sizes = [4, 384], strides = [1, 1]} : vector<4x512xf32> to vector<4x384xf32>
    %cst_85 = arith.constant dense<0.000000e+00> : vector<4x384xf32>
    %114 = tpu.matmul %112, %113, %cst_85 {dimension_numbers = #tpu.dot_dimension_numbers<[1], [0], [0], [1], [0, 0, 1, 1], [], []>} : vector<4x4xf32>, vector<4x384xf32>, vector<4x384xf32> -> vector<4x384xf32>
    %115 = arith.addf %110, %114 : vector<4x384xf32>
    %c5_86 = arith.constant 5 : index
    %c0_87 = arith.constant 0 : index
    %c0_88 = arith.constant 0 : index
    %116 = vector.load %arg7[%c5_86, %c0_87, %c0_88] : memref<9x4x4xf32, #tpu.memory_space<vmem>>, vector<1x4x4xf32>
    %117 = vector.shape_cast %116 : vector<1x4x4xf32> to vector<4x4xf32>
    %118 = vector.extract_strided_slice %57 {offsets = [0, 110], sizes = [4, 384], strides = [1, 1]} : vector<4x640xf32> to vector<4x384xf32>
    %cst_89 = arith.constant dense<0.000000e+00> : vector<4x384xf32>
    %119 = tpu.matmul %117, %118, %cst_89 {dimension_numbers = #tpu.dot_dimension_numbers<[1], [0], [0], [1], [0, 0, 1, 1], [], []>} : vector<4x4xf32>, vector<4x384xf32>, vector<4x384xf32> -> vector<4x384xf32>
    %120 = arith.addf %115, %119 : vector<4x384xf32>
    %c6_90 = arith.constant 6 : index
    %c0_91 = arith.constant 0 : index
    %c0_92 = arith.constant 0 : index
    %121 = vector.load %arg6[%c6_90, %c0_91, %c0_92] : memref<9x4x4xf32, #tpu.memory_space<vmem>>, vector<1x4x4xf32>
    %122 = vector.shape_cast %121 : vector<1x4x4xf32> to vector<4x4xf32>
    %123 = vector.extract_strided_slice %59 {offsets = [0, 36], sizes = [4, 384], strides = [1, 1]} : vector<4x512xf32> to vector<4x384xf32>
    %cst_93 = arith.constant dense<0.000000e+00> : vector<4x384xf32>
    %124 = tpu.matmul %122, %123, %cst_93 {dimension_numbers = #tpu.dot_dimension_numbers<[1], [0], [0], [1], [0, 0, 1, 1], [], []>} : vector<4x4xf32>, vector<4x384xf32>, vector<4x384xf32> -> vector<4x384xf32>
    %125 = arith.addf %120, %124 : vector<4x384xf32>
    %c6_94 = arith.constant 6 : index
    %c0_95 = arith.constant 0 : index
    %c0_96 = arith.constant 0 : index
    %126 = vector.load %arg7[%c6_94, %c0_95, %c0_96] : memref<9x4x4xf32, #tpu.memory_space<vmem>>, vector<1x4x4xf32>
    %127 = vector.shape_cast %126 : vector<1x4x4xf32> to vector<4x4xf32>
    %128 = vector.extract_strided_slice %57 {offsets = [0, 126], sizes = [4, 384], strides = [1, 1]} : vector<4x640xf32> to vector<4x384xf32>
    %cst_97 = arith.constant dense<0.000000e+00> : vector<4x384xf32>
    %129 = tpu.matmul %127, %128, %cst_97 {dimension_numbers = #tpu.dot_dimension_numbers<[1], [0], [0], [1], [0, 0, 1, 1], [], []>} : vector<4x4xf32>, vector<4x384xf32>, vector<4x384xf32> -> vector<4x384xf32>
    %130 = arith.addf %125, %129 : vector<4x384xf32>
    %c7_98 = arith.constant 7 : index
    %c0_99 = arith.constant 0 : index
    %c0_100 = arith.constant 0 : index
    %131 = vector.load %arg6[%c7_98, %c0_99, %c0_100] : memref<9x4x4xf32, #tpu.memory_space<vmem>>, vector<1x4x4xf32>
    %132 = vector.shape_cast %131 : vector<1x4x4xf32> to vector<4x4xf32>
    %133 = vector.extract_strided_slice %59 {offsets = [0, 37], sizes = [4, 384], strides = [1, 1]} : vector<4x512xf32> to vector<4x384xf32>
    %cst_101 = arith.constant dense<0.000000e+00> : vector<4x384xf32>
    %134 = tpu.matmul %132, %133, %cst_101 {dimension_numbers = #tpu.dot_dimension_numbers<[1], [0], [0], [1], [0, 0, 1, 1], [], []>} : vector<4x4xf32>, vector<4x384xf32>, vector<4x384xf32> -> vector<4x384xf32>
    %135 = arith.addf %130, %134 : vector<4x384xf32>
    %c7_102 = arith.constant 7 : index
    %c0_103 = arith.constant 0 : index
    %c0_104 = arith.constant 0 : index
    %136 = vector.load %arg7[%c7_102, %c0_103, %c0_104] : memref<9x4x4xf32, #tpu.memory_space<vmem>>, vector<1x4x4xf32>
    %137 = vector.shape_cast %136 : vector<1x4x4xf32> to vector<4x4xf32>
    %138 = vector.extract_strided_slice %57 {offsets = [0, 127], sizes = [4, 384], strides = [1, 1]} : vector<4x640xf32> to vector<4x384xf32>
    %cst_105 = arith.constant dense<0.000000e+00> : vector<4x384xf32>
    %139 = tpu.matmul %137, %138, %cst_105 {dimension_numbers = #tpu.dot_dimension_numbers<[1], [0], [0], [1], [0, 0, 1, 1], [], []>} : vector<4x4xf32>, vector<4x384xf32>, vector<4x384xf32> -> vector<4x384xf32>
    %140 = arith.addf %135, %139 : vector<4x384xf32>
    %c8_106 = arith.constant 8 : index
    %c0_107 = arith.constant 0 : index
    %c0_108 = arith.constant 0 : index
    %141 = vector.load %arg6[%c8_106, %c0_107, %c0_108] : memref<9x4x4xf32, #tpu.memory_space<vmem>>, vector<1x4x4xf32>
    %142 = vector.shape_cast %141 : vector<1x4x4xf32> to vector<4x4xf32>
    %143 = vector.extract_strided_slice %59 {offsets = [0, 38], sizes = [4, 384], strides = [1, 1]} : vector<4x512xf32> to vector<4x384xf32>
    %cst_109 = arith.constant dense<0.000000e+00> : vector<4x384xf32>
    %144 = tpu.matmul %142, %143, %cst_109 {dimension_numbers = #tpu.dot_dimension_numbers<[1], [0], [0], [1], [0, 0, 1, 1], [], []>} : vector<4x4xf32>, vector<4x384xf32>, vector<4x384xf32> -> vector<4x384xf32>
    %145 = arith.addf %140, %144 : vector<4x384xf32>
    %c8_110 = arith.constant 8 : index
    %c0_111 = arith.constant 0 : index
    %c0_112 = arith.constant 0 : index
    %146 = vector.load %arg7[%c8_110, %c0_111, %c0_112] : memref<9x4x4xf32, #tpu.memory_space<vmem>>, vector<1x4x4xf32>
    %147 = vector.shape_cast %146 : vector<1x4x4xf32> to vector<4x4xf32>
    %148 = vector.extract_strided_slice %57 {offsets = [0, 128], sizes = [4, 384], strides = [1, 1]} : vector<4x640xf32> to vector<4x384xf32>
    %cst_113 = arith.constant dense<0.000000e+00> : vector<4x384xf32>
    %149 = tpu.matmul %147, %148, %cst_113 {dimension_numbers = #tpu.dot_dimension_numbers<[1], [0], [0], [1], [0, 0, 1, 1], [], []>} : vector<4x4xf32>, vector<4x384xf32>, vector<4x384xf32> -> vector<4x384xf32>
    %150 = arith.addf %145, %149 : vector<4x384xf32>
    %c0_114 = arith.constant 0 : index
    %c0_115 = arith.constant 0 : index
    %151 = vector.load %arg8[%c0_114, %c0_115] : memref<4x1xf32, #tpu.memory_space<vmem>>, vector<4x1xf32>
    %152 = vector.broadcast %151 : vector<4x1xf32> to vector<4x384xf32>
    %153 = arith.addf %150, %152 : vector<4x384xf32>
    %cst_116 = arith.constant 0.000000e+00 : f32
    %154 = vector.broadcast %cst_116 : f32 to vector<4x384xf32>
    %155 = arith.maximumf %153, %154 : vector<4x384xf32>
    %c0_117 = arith.constant 0 : index
    %c0_118 = arith.constant 0 : index
    %156 = vector.load %arg12[%c0_117, %c0_118] : memref<1x384xf32, #tpu.memory_space<vmem>>, vector<1x384xf32>
    %157 = vector.broadcast %156 : vector<1x384xf32> to vector<4x384xf32>
    %158 = arith.mulf %155, %157 : vector<4x384xf32>
    %cst_119 = arith.constant 0.000000e+00 : f32
    %159 = vector.broadcast %cst_119 : f32 to vector<4x128xf32>
    %160 = tpu.concatenate %159, %158, %159 in 1 : vector<4x128xf32>, vector<4x384xf32>, vector<4x128xf32> -> vector<4x640xf32>
    %cst_120 = arith.constant 0.000000e+00 : f32
    %161 = vector.broadcast %cst_120 : f32 to vector<4x384xf32>
    %c0_121 = arith.constant 0 : index
    %c0_122 = arith.constant 0 : index
    %c0_123 = arith.constant 0 : index
    %162 = vector.load %arg9[%c0_121, %c0_122, %c0_123] : memref<9x4x4xf32, #tpu.memory_space<vmem>>, vector<1x4x4xf32>
    %163 = vector.shape_cast %162 : vector<1x4x4xf32> to vector<4x4xf32>
    %164 = vector.extract_strided_slice %160 {offsets = [0, 109], sizes = [4, 384], strides = [1, 1]} : vector<4x640xf32> to vector<4x384xf32>
    %cst_124 = arith.constant dense<0.000000e+00> : vector<4x384xf32>
    %165 = tpu.matmul %163, %164, %cst_124 {dimension_numbers = #tpu.dot_dimension_numbers<[1], [0], [0], [1], [0, 0, 1, 1], [], []>} : vector<4x4xf32>, vector<4x384xf32>, vector<4x384xf32> -> vector<4x384xf32>
    %166 = arith.addf %161, %165 : vector<4x384xf32>
    %c1_125 = arith.constant 1 : index
    %c0_126 = arith.constant 0 : index
    %c0_127 = arith.constant 0 : index
    %167 = vector.load %arg9[%c1_125, %c0_126, %c0_127] : memref<9x4x4xf32, #tpu.memory_space<vmem>>, vector<1x4x4xf32>
    %168 = vector.shape_cast %167 : vector<1x4x4xf32> to vector<4x4xf32>
    %169 = vector.extract_strided_slice %160 {offsets = [0, 110], sizes = [4, 384], strides = [1, 1]} : vector<4x640xf32> to vector<4x384xf32>
    %cst_128 = arith.constant dense<0.000000e+00> : vector<4x384xf32>
    %170 = tpu.matmul %168, %169, %cst_128 {dimension_numbers = #tpu.dot_dimension_numbers<[1], [0], [0], [1], [0, 0, 1, 1], [], []>} : vector<4x4xf32>, vector<4x384xf32>, vector<4x384xf32> -> vector<4x384xf32>
    %171 = arith.addf %166, %170 : vector<4x384xf32>
    %c2_129 = arith.constant 2 : index
    %c0_130 = arith.constant 0 : index
    %c0_131 = arith.constant 0 : index
    %172 = vector.load %arg9[%c2_129, %c0_130, %c0_131] : memref<9x4x4xf32, #tpu.memory_space<vmem>>, vector<1x4x4xf32>
    %173 = vector.shape_cast %172 : vector<1x4x4xf32> to vector<4x4xf32>
    %174 = vector.extract_strided_slice %160 {offsets = [0, 111], sizes = [4, 384], strides = [1, 1]} : vector<4x640xf32> to vector<4x384xf32>
    %cst_132 = arith.constant dense<0.000000e+00> : vector<4x384xf32>
    %175 = tpu.matmul %173, %174, %cst_132 {dimension_numbers = #tpu.dot_dimension_numbers<[1], [0], [0], [1], [0, 0, 1, 1], [], []>} : vector<4x4xf32>, vector<4x384xf32>, vector<4x384xf32> -> vector<4x384xf32>
    %176 = arith.addf %171, %175 : vector<4x384xf32>
    %c3_133 = arith.constant 3 : index
    %c0_134 = arith.constant 0 : index
    %c0_135 = arith.constant 0 : index
    %177 = vector.load %arg9[%c3_133, %c0_134, %c0_135] : memref<9x4x4xf32, #tpu.memory_space<vmem>>, vector<1x4x4xf32>
    %178 = vector.shape_cast %177 : vector<1x4x4xf32> to vector<4x4xf32>
    %179 = vector.extract_strided_slice %160 {offsets = [0, 127], sizes = [4, 384], strides = [1, 1]} : vector<4x640xf32> to vector<4x384xf32>
    %cst_136 = arith.constant dense<0.000000e+00> : vector<4x384xf32>
    %180 = tpu.matmul %178, %179, %cst_136 {dimension_numbers = #tpu.dot_dimension_numbers<[1], [0], [0], [1], [0, 0, 1, 1], [], []>} : vector<4x4xf32>, vector<4x384xf32>, vector<4x384xf32> -> vector<4x384xf32>
    %181 = arith.addf %176, %180 : vector<4x384xf32>
    %c4_137 = arith.constant 4 : index
    %c0_138 = arith.constant 0 : index
    %c0_139 = arith.constant 0 : index
    %182 = vector.load %arg9[%c4_137, %c0_138, %c0_139] : memref<9x4x4xf32, #tpu.memory_space<vmem>>, vector<1x4x4xf32>
    %183 = vector.shape_cast %182 : vector<1x4x4xf32> to vector<4x4xf32>
    %184 = vector.extract_strided_slice %160 {offsets = [0, 128], sizes = [4, 384], strides = [1, 1]} : vector<4x640xf32> to vector<4x384xf32>
    %cst_140 = arith.constant dense<0.000000e+00> : vector<4x384xf32>
    %185 = tpu.matmul %183, %184, %cst_140 {dimension_numbers = #tpu.dot_dimension_numbers<[1], [0], [0], [1], [0, 0, 1, 1], [], []>} : vector<4x4xf32>, vector<4x384xf32>, vector<4x384xf32> -> vector<4x384xf32>
    %186 = arith.addf %181, %185 : vector<4x384xf32>
    %c5_141 = arith.constant 5 : index
    %c0_142 = arith.constant 0 : index
    %c0_143 = arith.constant 0 : index
    %187 = vector.load %arg9[%c5_141, %c0_142, %c0_143] : memref<9x4x4xf32, #tpu.memory_space<vmem>>, vector<1x4x4xf32>
    %188 = vector.shape_cast %187 : vector<1x4x4xf32> to vector<4x4xf32>
    %189 = vector.extract_strided_slice %160 {offsets = [0, 129], sizes = [4, 384], strides = [1, 1]} : vector<4x640xf32> to vector<4x384xf32>
    %cst_144 = arith.constant dense<0.000000e+00> : vector<4x384xf32>
    %190 = tpu.matmul %188, %189, %cst_144 {dimension_numbers = #tpu.dot_dimension_numbers<[1], [0], [0], [1], [0, 0, 1, 1], [], []>} : vector<4x4xf32>, vector<4x384xf32>, vector<4x384xf32> -> vector<4x384xf32>
    %191 = arith.addf %186, %190 : vector<4x384xf32>
    %c6_145 = arith.constant 6 : index
    %c0_146 = arith.constant 0 : index
    %c0_147 = arith.constant 0 : index
    %192 = vector.load %arg9[%c6_145, %c0_146, %c0_147] : memref<9x4x4xf32, #tpu.memory_space<vmem>>, vector<1x4x4xf32>
    %193 = vector.shape_cast %192 : vector<1x4x4xf32> to vector<4x4xf32>
    %194 = vector.extract_strided_slice %160 {offsets = [0, 145], sizes = [4, 384], strides = [1, 1]} : vector<4x640xf32> to vector<4x384xf32>
    %cst_148 = arith.constant dense<0.000000e+00> : vector<4x384xf32>
    %195 = tpu.matmul %193, %194, %cst_148 {dimension_numbers = #tpu.dot_dimension_numbers<[1], [0], [0], [1], [0, 0, 1, 1], [], []>} : vector<4x4xf32>, vector<4x384xf32>, vector<4x384xf32> -> vector<4x384xf32>
    %196 = arith.addf %191, %195 : vector<4x384xf32>
    %c7_149 = arith.constant 7 : index
    %c0_150 = arith.constant 0 : index
    %c0_151 = arith.constant 0 : index
    %197 = vector.load %arg9[%c7_149, %c0_150, %c0_151] : memref<9x4x4xf32, #tpu.memory_space<vmem>>, vector<1x4x4xf32>
    %198 = vector.shape_cast %197 : vector<1x4x4xf32> to vector<4x4xf32>
    %199 = vector.extract_strided_slice %160 {offsets = [0, 146], sizes = [4, 384], strides = [1, 1]} : vector<4x640xf32> to vector<4x384xf32>
    %cst_152 = arith.constant dense<0.000000e+00> : vector<4x384xf32>
    %200 = tpu.matmul %198, %199, %cst_152 {dimension_numbers = #tpu.dot_dimension_numbers<[1], [0], [0], [1], [0, 0, 1, 1], [], []>} : vector<4x4xf32>, vector<4x384xf32>, vector<4x384xf32> -> vector<4x384xf32>
    %201 = arith.addf %196, %200 : vector<4x384xf32>
    %c8_153 = arith.constant 8 : index
    %c0_154 = arith.constant 0 : index
    %c0_155 = arith.constant 0 : index
    %202 = vector.load %arg9[%c8_153, %c0_154, %c0_155] : memref<9x4x4xf32, #tpu.memory_space<vmem>>, vector<1x4x4xf32>
    %203 = vector.shape_cast %202 : vector<1x4x4xf32> to vector<4x4xf32>
    %204 = vector.extract_strided_slice %160 {offsets = [0, 147], sizes = [4, 384], strides = [1, 1]} : vector<4x640xf32> to vector<4x384xf32>
    %cst_156 = arith.constant dense<0.000000e+00> : vector<4x384xf32>
    %205 = tpu.matmul %203, %204, %cst_156 {dimension_numbers = #tpu.dot_dimension_numbers<[1], [0], [0], [1], [0, 0, 1, 1], [], []>} : vector<4x4xf32>, vector<4x384xf32>, vector<4x384xf32> -> vector<4x384xf32>
    %206 = arith.addf %201, %205 : vector<4x384xf32>
    %c0_157 = arith.constant 0 : index
    %c0_158 = arith.constant 0 : index
    %207 = vector.load %arg10[%c0_157, %c0_158] : memref<4x1xf32, #tpu.memory_space<vmem>>, vector<4x1xf32>
    %208 = vector.broadcast %207 : vector<4x1xf32> to vector<4x384xf32>
    %209 = arith.addf %206, %208 : vector<4x384xf32>
    %cst_159 = arith.constant 0.000000e+00 : f32
    %210 = vector.broadcast %cst_159 : f32 to vector<4x384xf32>
    %211 = arith.maximumf %209, %210 : vector<4x384xf32>
    %c0_160 = arith.constant 0 : index
    %c0_161 = arith.constant 0 : index
    %c0_162 = arith.constant 0 : index
    %212 = vector.load %arg13[%c0_160, %c0_161, %c0_162] : memref<1x4x384xf32, #tpu.memory_space<vmem>>, vector<1x4x384xf32>
    %213 = vector.shape_cast %212 : vector<1x4x384xf32> to vector<4x384xf32>
    %214 = vector.shape_cast %211 : vector<4x384xf32> to vector<1x4x384xf32>
    tpu.vector_store %arg13[%c0_160, %c0_161, %c0_162], %214 {strides = array<i32>} : memref<1x4x384xf32, #tpu.memory_space<vmem>>, vector<1x4x384xf32>,
    return
  }
  func.func @transform_0(%arg0: i32) -> (i32, i32, i32) {
    %c0_i32 = arith.constant 0 : i32
    %c0_i32_0 = arith.constant 0 : i32
    %c0_i32_1 = arith.constant 0 : i32
    return %arg0, %c0_i32, %c0_i32_0 : i32, i32, i32
  }
  func.func @transform_1(%arg0: i32) -> (i32, i32, i32) {
    %c0_i32 = arith.constant 0 : i32
    %c0_i32_0 = arith.constant 0 : i32
    %c0_i32_1 = arith.constant 0 : i32
    return %arg0, %c0_i32, %c0_i32_0 : i32, i32, i32
  }
  func.func @transform_2(%arg0: i32) -> (i32, i32) {
    %c0_i32 = arith.constant 0 : i32
    %c0_i32_0 = arith.constant 0 : i32
    %c0_i32_1 = arith.constant 0 : i32
    return %c0_i32, %c0_i32_0 : i32, i32
  }
  func.func @transform_3(%arg0: i32) -> (i32, i32, i32) {
    %c0_i32 = arith.constant 0 : i32
    %c0_i32_0 = arith.constant 0 : i32
    %c0_i32_1 = arith.constant 0 : i32
    %c0_i32_2 = arith.constant 0 : i32
    return %c0_i32, %c0_i32_0, %c0_i32_1 : i32, i32, i32
  }
  func.func @transform_4(%arg0: i32) -> (i32, i32) {
    %c0_i32 = arith.constant 0 : i32
    %c0_i32_0 = arith.constant 0 : i32
    %c0_i32_1 = arith.constant 0 : i32
    return %c0_i32, %c0_i32_0 : i32, i32
  }
  func.func @transform_5(%arg0: i32) -> (i32, i32, i32) {
    %c0_i32 = arith.constant 0 : i32
    %c0_i32_0 = arith.constant 0 : i32
    %c0_i32_1 = arith.constant 0 : i32
    %c0_i32_2 = arith.constant 0 : i32
    return %c0_i32, %c0_i32_0, %c0_i32_1 : i32, i32, i32
  }
  func.func @transform_6(%arg0: i32) -> (i32, i32, i32) {
    %c0_i32 = arith.constant 0 : i32
    %c0_i32_0 = arith.constant 0 : i32
    %c0_i32_1 = arith.constant 0 : i32
    %c0_i32_2 = arith.constant 0 : i32
    return %c0_i32, %c0_i32_0, %c0_i32_1 : i32, i32, i32
  }
  func.func @transform_7(%arg0: i32) -> (i32, i32) {
    %c0_i32 = arith.constant 0 : i32
    %c0_i32_0 = arith.constant 0 : i32
    %c0_i32_1 = arith.constant 0 : i32
    return %c0_i32, %c0_i32_0 : i32, i32
  }
  func.func @transform_8(%arg0: i32) -> (i32, i32, i32) {
    %c0_i32 = arith.constant 0 : i32
    %c0_i32_0 = arith.constant 0 : i32
    %c0_i32_1 = arith.constant 0 : i32
    %c0_i32_2 = arith.constant 0 : i32
    return %c0_i32, %c0_i32_0, %c0_i32_1 : i32, i32, i32
  }
  func.func @transform_9(%arg0: i32) -> (i32, i32) {
    %c0_i32 = arith.constant 0 : i32
    %c0_i32_0 = arith.constant 0 : i32
    %c0_i32_1 = arith.constant 0 : i32
    return %c0_i32, %c0_i32_0 : i32, i32
  }
  func.func @transform_10(%arg0: i32) -> (i32, i32) {
    %c0_i32 = arith.constant 0 : i32
    %c0_i32_0 = arith.constant 0 : i32
    %c0_i32_1 = arith.constant 0 : i32
    return %c0_i32, %c0_i32_0 : i32, i32
  }
  func.func @transform_11(%arg0: i32) -> (i32, i32) {
    %c0_i32 = arith.constant 0 : i32
    %c0_i32_0 = arith.constant 0 : i32
    %c0_i32_1 = arith.constant 0 : i32
    return %c0_i32, %c0_i32_0 : i32, i32
  }
  func.func @transform_12(%arg0: i32) -> (i32, i32, i32) {
    %c0_i32 = arith.constant 0 : i32
    %c0_i32_0 = arith.constant 0 : i32
    %c0_i32_1 = arith.constant 0 : i32
    return %arg0, %c0_i32, %c0_i32_0 : i32, i32, i32
  }
}

</mosaic_0001>

<bundles_post_ra>
// kernel: up_res_forward.1
= control target key start
LH: loop header
LB: loop body
LE: loop exit
PB: predicated region body
PF: predicated region fallthrough
CT: control target
= control target key end

     0   :  { %s4151_s21 = smov 0   ;;  %s5048_s0 = inlined_call_operand.vmem [shape: f32[2,4,64], index: 0, kind: input, shape index: {}]   ;;  %s5049_s1 = inlined_call_operand.vmem [shape: f32[2,4,512], index: 1, kind: input, shape index: {}]   ;;  %s5050_s2 = inlined_call_operand.vmem [shape: f32[64,512], index: 2, kind: input, shape index: {}]   ;;  %s5051_s3 = inlined_call_operand.vmem [shape: f32[9,4,4], index: 3, kind: input, shape index: {}]   ;;  %s5052_s4 = inlined_call_operand.vmem [shape: f32[4,1], index: 4, kind: input, shape index: {}]   ;;  %s5053_s5 = inlined_call_operand.vmem [shape: f32[9,4,4], index: 5, kind: input, shape index: {}]   ;;  %s5054_s6 = inlined_call_operand.vmem [shape: f32[9,4,4], index: 6, kind: input, shape index: {}]   ;;  %s5055_s7 = inlined_call_operand.vmem [shape: f32[4,1], index: 7, kind: input, shape index: {}]   ;;  %s5056_s8 = inlined_call_operand.vmem [shape: f32[9,4,4], index: 8, kind: input, shape index: {}]   ;;  %s5057_s9 = inlined_call_operand.vmem [shape: f32[4,1], index: 9, kind: input, shape index: {}]   ;;  %s5058_s10 = inlined_call_operand.vmem [shape: f32[1,384], index: 10, kind: input, shape index: {}]   ;;  %s5059_s11 = inlined_call_operand.vmem [shape: f32[1,384], index: 11, kind: input, shape index: {}]   ;;  %s5060_s12 = inlined_call_operand.vmem [shape: f32[2,4,384], index: 12, kind: output, shape index: {}]  }
   0x1 LB: > { %s3762_s22 = sadd.s32 4294967295, %s4064_s21   ;;  %p3766_p0 = scmp.ge.s32.totalorder %s4064_s21, 1  ;;  %s4064_s21 = sphi %s4151_s21, %s22_s21  }
   0x2   : > { %p371_p1 = scmp.lt.s32.totalorder %s4064_s21, 3 }
   0x4   : > { %p372_p2 = pnand %p3766_p0, %p371_p1 }
   0x5   : > { %p417_p3 = scmp.lt.s32.totalorder (!%p372_p2), %s3762_s22, 1  ;;  %s4067_s16 = smov (!%p372_p2), 126  }
   0x6   : > { %375 = sbr.rel (%p372_p2) target bundleno = 1177 (0x499), region = 68  ;;  %s4069_s17 = smov (!%p372_p2), 110  }
   0x7   : > { %s4071_s18 = smov (!%p372_p2), 92   ;;  %s4072_s19 = smov (!%p372_p2), 91  }
   0x8   : > { %s4073_s20 = smov (!%p372_p2), 90   ;;  %s4076_s28 = smov (!%p372_p2), 38  }
   0x9   : > { %s4077_s14 = smov (!%p372_p2), 37   ;;  %s4079_s15 = smov (!%p372_p2), 20  }
   0xa   : > { %s4081_s26 = smov (!%p372_p2), 18   ;;  %s4082_s27 = smov (!%p372_p2), 2  }
   0xb   : > { %v460_v0 = vld [vmem:[%s5050_s2 + $0xe0] sm:$0xff]  ;;  %v461_v1 = vld [vmem:[%s5050_s2 + $0xe8] sm:$0xff]  ;;  %v462_v4 = vld [vmem:[%s5050_s2 + $0xf0] sm:$0xff]  ;;  %s5062_s22 = smov (!%p417_p3, %s3762_s22), 1  ;;  %vm464_vm0 = vcmask 523264   ;;  %vm571_vm1 = vcmask 1043456  }
   0xc   : > { %v456_v2 = vld [vmem:[%s5050_s2 + $0xc0] sm:$0xff]  ;;  %476 = vmatpush.msra.mxu0 %v460_v0  ;;  %496 = vmatpush.msra.mxu1 %v461_v1  ;;  %v457_v3 = vld [vmem:[%s5050_s2 + $0xc8] sm:$0xff]  ;;  %v458_v7 = vld [vmem:[%s5050_s2 + $0xd0] sm:$0xff]  ;;  %s4025_s29 = sshll.u32 %s5062_s22, 4  ;;  %s3767_s30 = sshll.u32 %s5062_s22, 2  ;;  %vm567_vm2 = vcmask 31744  }
   0xd   : > { %516 = vmatpush.msra.mxu2 %v462_v4  ;;  %v452_v5 = vld [vmem:[%s5050_s2 + $0xa0] sm:$0xff]  ;;  %v453_v6 = vld [vmem:[%s5050_s2 + $0xa8] sm:$0xff]  ;;  %v454_v8 = vld [vmem:[%s5050_s2 + $0xb0] sm:$0xff]  ;;  %s425_s24 = scalar_lea.vmem %s5049_s1, %s4025_s29  ;;  %s420_s13 = scalar_lea.vmem %s5048_s0, %s3767_s30  ;;  %vm563_vm3 = vcmask 1039360   ;;  %vm803_vm4 = vcmask 900096   ;;  %vm717_vm5 = vcmask 1031168  }
   0xe   : > { %477 = vmatpush.msra.mxu0 %v456_v2  ;;  %497 = vmatpush.msra.mxu1 %v457_v3  ;;  %v448_v9 = vld [vmem:[%s5050_s2 + $0x80] sm:$0xff]  ;;  %v449_v10 = vld [vmem:[%s5050_s2 + $0x88] sm:$0xff]  ;;  %v450_v11 = vld [vmem:[%s5050_s2 + $0x90] sm:$0xff]  ;;  %s4068_s29 = smov 127   ;;  %s4070_s30 = smov 109   ;;  %vm889_vm6 = vcmask 891904  }
   0xf   : > { %517 = vmatpush.msra.mxu2 %v458_v7  ;;  %v463_v12 = vld [vmem:[%s5050_s2 + $0xf8] sm:$0xff]  ;;  %v444_v13 = vld [vmem:[%s5050_s2 + $0x60] sm:$0xff]  ;;  %v445_v14 = vld [vmem:[%s5050_s2 + $0x68] sm:$0xff]  ;;  %vm975_vm7 = vcmask 883712   ;;  %vm1061_vm8 = vcmask 752640   ;;  %vm1147_vm9 = vcmask 744448  }
  0x10   : > { %478 = vmatpush.msra.mxu0 %v452_v5  ;;  %498 = vmatpush.msra.mxu1 %v453_v6  ;;  %v446_v15 = vld [vmem:[%s5050_s2 + $0x70] sm:$0xff]  ;;  %v459_v16 = vld [vmem:[%s5050_s2 + $0xd8] sm:$0xff]  ;;  %v440_v17 = vld [vmem:[%s5050_s2 + $0x40] sm:$0xff]  ;;  %vm1233_vm10 = vcmask 736256   ;;  %vm1953_vm11 = vcmask 162816   ;;  %vm1345_vm12 = vcmask 310272  }
  0x11   : > { %518 = vmatpush.msra.mxu2 %v454_v8  ;;  %536 = vmatpush.msra.mxu3 %v463_v12  ;;  %v441_v18 = vld [vmem:[%s5050_s2 + $0x48] sm:$0xff]  ;;  %v455_v19 = vld [vmem:[%s5050_s2 + $0xb8] sm:$0xff]  ;;  %v442_v20 = vld [vmem:[%s5050_s2 + $0x50] sm:$0xff]  ;;  %vm1597_vm13 = vcmask 302080   ;;  %vm1775_vm14 = vcmask 293888   ;;  %vm2131_vm15 = vcmask 154624  }
  0x12   : > { %479 = vmatpush.msra.mxu0 %v448_v9  ;;  %499 = vmatpush.msra.mxu1 %v449_v10  ;;  %v4229_v21 = vld [vmem:[%s425_s24] sm:$0xff]  ;;  %v4231_v22 = vld [vmem:[%s425_s24 + $0x8] sm:$0xff]  ;;  %v451_v25 = vld [vmem:[%s5050_s2 + $0x98] sm:$0xff]  ;;  %s4066_s24 = smov 108   ;;  %s4084_s25 = smov 17  }
  0x13   : > { %519 = vmatpush.msra.mxu2 %v450_v11  ;;  %537 = vmatpush.msra.mxu3 %v459_v16  ;;  %v436_v23 = vld [vmem:[%s5050_s2 + $0x20] sm:$0xff]  ;;  %v437_v24 = vld [vmem:[%s5050_s2 + $0x28] sm:$0xff]  ;;  %1420 = vst [vmem:[#allocation1] ss:$2 sm:$0xff] %v4229_v21  ;;  %v438_v26 = vld [vmem:[%s5050_s2 + $0x30] sm:$0xff] }
  0x14   : > { %480 = vmatpush.msra.mxu0 %v444_v13  ;;  %500 = vmatpush.msra.mxu1 %v445_v14  ;;  %1422 = vst [vmem:[#allocation1 + $0x10] ss:$2 sm:$0xff] %v4231_v22  ;;  %v447_v27 = vld [vmem:[%s5050_s2 + $0x78] sm:$0xff]  ;;  %v432_v28 = vld [vmem:[%s5050_s2] sm:$0xff]  ;;  %v433_v29 = vld [vmem:[%s5050_s2 + $0x8] sm:$0xff] }
  0x15   : > { %520 = vmatpush.msra.mxu2 %v446_v15  ;;  %538 = vmatpush.msra.mxu3 %v455_v19  ;;  %v431_v30 = vld [vmem:[%s420_s13] sm:$0xf]  ;;  %v434_v31 = vld [vmem:[%s5050_s2 + $0x10] sm:$0xff]  ;;  %v443_v32 = vld [vmem:[%s5050_s2 + $0x58] sm:$0xff]  ;;  %s4078_s13 = smov 36  }
  0x16   : > { %481 = vmatpush.msra.mxu0 %v440_v17  ;;  %501 = vmatpush.msra.mxu1 %v441_v18  ;;  %v439_v33 = vld [vmem:[%s5050_s2 + $0x38] sm:$0xff]  ;;  %v548_v44 = vld [vmem:[%s5051_s3] sm:$0xf]  ;;  %v3775_v53 = vld [vmem:[%s5051_s3 + $0x4] sm:$0xf] }
  0x17   : > { %521 = vmatpush.msra.mxu2 %v442_v20  ;;  %539 = vmatpush.msra.mxu3 %v451_v25  ;;  %v435_v37 = vld [vmem:[%s5050_s2 + $0x18] sm:$0xff]  ;;  %v3788_v61 = vld [vmem:[%s5051_s3 + $0x8] sm:$0xf]  ;;  %v3795_v1 = vld [vmem:[%s5051_s3 + $0xc] sm:$0xf] }
  0x18   : > { %482 = vmatpush.msra.mxu0 %v436_v23  ;;  %502 = vmatpush.msra.mxu1 %v437_v24  ;;  %v3802_v5 = vld [vmem:[%s5051_s3 + $0x10] sm:$0xf]  ;;  %v3809_v19 = vld [vmem:[%s5051_s3 + $0x14] sm:$0xf]  ;;  %v1309_v23 = vld [vmem:[%s5052_s4] sm:$0xf] }
  0x19   : > { %522 = vmatpush.msra.mxu2 %v438_v26  ;;  %540 = vmatpush.msra.mxu3 %v447_v27  ;;  %v4074_v24 = vmov 0  }
  0x1a   : > { %483 = vmatpush.msra.mxu0 %v432_v28  ;;  %503 = vmatpush.msra.mxu1 %v433_v29  ;;  %v4270_v34 = vld.sshfl [vmem:[#allocation1] sm:$0xff pattern:$0x75316420]  ;;  %v4272_v35 = vld.sshfl [vmem:[#allocation1 + $0x8] sm:$0xff pattern:$0x75316420] }
  0x1b   : > { %3771 = vmatmul.msk.f32.vlgmr.msra.gmra.mxu0 %vm464_vm0, %v431_v30  ;;  %3772 = vmatmul.msk.f32.vlgmr.msra.gmra.mxu1 %vm464_vm0, %v431_v30  ;;  %v4274_v36 = vld.sshfl [vmem:[#allocation1 + $0x10] sm:$0xff pattern:$0x75316420]  ;;  %1497 = vst [vmem:[#allocation1] ss:$2 sm:$0xff] %v4229_v21 }
  0x1c   : > { %523 = vmatpush.msra.mxu2 %v434_v31  ;;  %541 = vmatpush.msra.mxu3 %v443_v32  ;;  %1499 = vst [vmem:[#allocation1 + $0x10] ss:$2 sm:$0xff] %v4231_v22 }
  0x1d   : > { %3773 = vmatmul.msk.f32.vlgmr.msra.gmra.mxu2 %vm464_vm0, %v431_v30  ;;  %4055 = vset.pattern.permute.xlu2 %v4074_v24 }
  0x1e   : > { %542 = vmatpush.msra.mxu3 %v439_v33  ;;  %4056 = vset.pattern.permute.xlu1 %v4074_v24 }
  0x1f   : > { %4057 = vset.pattern.permute.xlu0 %v4074_v24 }
  0x20   : > { %543 = vmatpush.msra.mxu3 %v435_v37 }
  0x21   : > { %3774 = vmatmul.msk.f32.vlgmr.msra.gmra.mxu3 %vm464_vm0, %v431_v30  ;;  %v3816_v30 = vld [vmem:[%s5051_s3 + $0x18] sm:$0xf]  ;;  %vm2309_vm0 = vcmask 146432  }
  0x98   : > { %v485_v38 = vpop.f32.mrf.mxu0  ;;  %v505_v39 = vpop.f32.mrf.mxu1 }
  0x99   : > { %969 = vrot.lane.b32.xlu1 %v505_v39, %s4066_s24  ;;  %709 = vrot.lane.b32.xlu2 %v485_v38, %s4067_s16 }
  0x9a   : > { %555 = vrot.lane.b32.xlu0 %v485_v38, %s4068_s29  ;;  %3782 = vmatpush.msk.msrb.mxu3 %vm571_vm1, %v485_v38 }
  0x9b   : > { %3783 = vmatmul.msk.f32.vlgmr.msrb.gmra.mxu3 %vm567_vm2, %v548_v44 }
  0xa0   : > { %v525_v40 = vpop.f32.mrf.mxu2 }
  0xa1   : > { %559 = vrot.lane.b32.xlu1 %v525_v40, %s4068_s29  ;;  %711 = vrot.lane.b32.xlu2 %v505_v39, %s4067_s16 }
  0xa2   : > { %557 = vrot.lane.b32.xlu0 %v505_v39, %s4068_s29 }
  0xa4   : > { %v545_v41 = vpop.f32.mrf.mxu3 }
  0xa9   : > { %561 = vrot.lane.b32.xlu1 %v545_v41, %s4068_s29  ;;  %795 = vrot.lane.b32.xlu2 %v485_v38, %s4069_s17 }
  0xaa   : > { %797 = vrot.lane.b32.xlu0 %v505_v39, %s4069_s17 }
  0xb1   : > { %715 = vrot.lane.b32.xlu1 %v545_v41, %s4067_s16  ;;  %881 = vrot.lane.b32.xlu2 %v485_v38, %s4070_s30 }
  0xb2   : > { %883 = vrot.lane.b32.xlu0 %v505_v39, %s4070_s30 }
  0xb9   : > { %799 = vrot.lane.b32.xlu1 %v525_v40, %s4069_s17  ;;  %1053 = vrot.lane.b32.xlu2 %v485_v38, %s4071_s18 }
  0xba   : > { %967 = vrot.lane.b32.xlu0 %v485_v38, %s4066_s24 }
  0xc1   : > { %801 = vrot.lane.b32.xlu1 %v545_v41, %s4069_s17  ;;  %885 = vrot.lane.b32.xlu2 %v525_v40, %s4070_s30 }
  0xc2   : > { %713 = vrot.lane.b32.xlu0 %v525_v40, %s4067_s16 }
  0xc9   : > { %973 = vrot.lane.b32.xlu1 %v545_v41, %s4066_s24  ;;  %971 = vrot.lane.b32.xlu2 %v525_v40, %s4066_s24 }
  0xca   : > { %887 = vrot.lane.b32.xlu0 %v545_v41, %s4070_s30 }
  0xd1   : > { %1057 = vrot.lane.b32.xlu1 %v525_v40, %s4071_s18  ;;  %1059 = vrot.lane.b32.xlu2 %v545_v41, %s4071_s18 }
  0xd2   : > { %1055 = vrot.lane.b32.xlu0 %v505_v39, %s4071_s18 }
  0xd9   : > { %1141 = vrot.lane.b32.xlu1 %v505_v39, %s4072_s19  ;;  %1225 = vrot.lane.b32.xlu2 %v485_v38, %s4073_s20 }
  0xda   : > { %1139 = vrot.lane.b32.xlu0 %v485_v38, %s4072_s19  ;;  %v3823_v38 = vld [vmem:[%s5051_s3 + $0x1c] sm:$0xf] }
  0xe1   : > { %1143 = vrot.lane.b32.xlu1 %v525_v40, %s4072_s19  ;;  %1145 = vrot.lane.b32.xlu2 %v545_v41, %s4072_s19 }
  0xe2   : > { %1227 = vrot.lane.b32.xlu0 %v505_v39, %s4073_s20 }
  0xe9   : > { %1231 = vrot.lane.b32.xlu1 %v545_v41, %s4073_s20  ;;  %1312 = vperm.xlu2 %4055, %v1309_v23  }
  0xea   : > { %1229 = vrot.lane.b32.xlu0 %v525_v40, %s4073_s20 }
  0xf3   : > { %v710_v42 = vpop.permute.xlu2 %709 }
  0xfb   : > { %v712_v43 = vpop.permute.xlu2 %711 }
  0xfc   : > { %v718_v59 = vsel %vm717_vm5, %v710_v42, %v712_v43 }
 0x103   : > { %v796_v45 = vpop.permute.xlu2 %795 }
 0x10b   : > { %v970_v46 = vpop.permute.xlu1 %969  ;;  %v882_v48 = vpop.permute.xlu2 %881 }
 0x10c   : > { %v556_v47 = vpop.permute.xlu0 %555 }
 0x113   : > { %v560_v49 = vpop.permute.xlu1 %559  ;;  %v4331_v54 = vpop.permute.xlu2 %1053 }
 0x114   : > { %v558_v50 = vpop.permute.xlu0 %557 }
 0x115   : > { %v564_v51 = vsel %vm563_vm3, %v556_v47, %v558_v50  ;;  %v565_v52 = vsel %vm563_vm3, %v558_v50, %v560_v49  ;;  %v1501_v50 = vld.sshfl [vmem:[#allocation1 + $0x8] sm:$0xff pattern:$0x75316420] }
 0x116   : > { %3776 = vmatpush.msk.msrb.mxu0 %vm571_vm1, %v564_v51  ;;  %3778 = vmatpush.msk.msrb.mxu1 %vm571_vm1, %v565_v52  ;;  %v1502_v51 = vld.sshfl [vmem:[#allocation1 + $0x10] sm:$0xff pattern:$0x75316420]  ;;  %v4075_v52 = vmov 0.0  }
 0x117   : > { %3779 = vmatmul.msk.f32.vlgmr.msrb.gmra.mxu1 %vm567_vm2, %v3775_v53  ;;  %3777 = vmatmul.msk.f32.vlgmr.msrb.gmra.mxu0 %vm567_vm2, %v3775_v53 }
 0x118   : > { %3784 = vmatpush.msk.msra.mxu0 %vm571_vm1, %v505_v39  ;;  %3786 = vmatpush.msk.msra.mxu1 %vm571_vm1, %v525_v40 }
 0x119   : > { %1506 = vrot.lane.b32.xlu1 %v1501_v50, %s4068_s29  ;;  %1508 = vrot.lane.b32.xlu2 %v1502_v51, %s4068_s29 }
 0x11a   : > { %1337 = vrot.lane.b32.xlu0 %v4075_v52, %s4076_s28 }
 0x11b   : > { %v562_v55 = vpop.permute.xlu1 %561  ;;  %v886_v62 = vpop.permute.xlu2 %885 }
 0x11c   : > { %v798_v56 = vpop.permute.xlu0 %797  ;;  %v566_v57 = vsel %vm563_vm3, %v560_v49, %v562_v55 }
 0x11d   : > { %v804_v58 = vsel %vm803_vm4, %v796_v45, %v798_v56  ;;  %3780 = vmatpush.msk.msrb.mxu2 %vm571_vm1, %v566_v57 }
 0x11e   : > { %3796 = vmatpush.msk.msrb.mxu1 %vm571_vm1, %v804_v58  ;;  %3781 = vmatmul.msk.f32.vlgmr.msrb.gmra.mxu2 %vm567_vm2, %v3775_v53  ;;  %v1500_v53 = vld.sshfl [vmem:[#allocation1] sm:$0xff pattern:$0x75316420] }
 0x11f   : > { %3789 = vmatpush.msk.msra.mxu2 %vm571_vm1, %v718_v59  ;;  %3787 = vmatmul.msk.f32.vlgmr.msra.gmra.mxu1 %vm567_vm2, %v548_v44  ;;  %1675 = vst [vmem:[#allocation1] ss:$2 sm:$0xff] %v4229_v21 }
 0x120   : > { %3785 = vmatmul.msk.f32.vlgmr.msra.gmra.mxu0 %vm567_vm2, %v548_v44  ;;  %v3830_v44 = vld [vmem:[%s5051_s3 + $0x20] sm:$0xf] }
 0x121   : > { %1504 = vrot.lane.b32.xlu1 %v1500_v53, %s4068_s29 }
 0x123   : > { %v716_v60 = vpop.permute.xlu1 %715  ;;  %v972_v8 = vpop.permute.xlu2 %971 }
 0x124   : > { %v884_v63 = vpop.permute.xlu0 %883  ;;  %v977_v13 = vsel %vm975_vm7, %v970_v46, %v972_v8 }
 0x125   : > { %v891_v0 = vsel %vm889_vm6, %v884_v63, %v886_v62  ;;  %v890_v12 = vsel %vm889_vm6, %v882_v48, %v884_v63 }
 0x126   : > { %3805 = vmatpush.msk.msra.mxu1 %vm571_vm1, %v891_v0  ;;  %3790 = vmatmul.msk.f32.vlgmr.msra.gmra.mxu2 %vm567_vm2, %v3788_v61  ;;  %v1679_v55 = vld.sshfl [vmem:[#allocation1 + $0x8] sm:$0xff pattern:$0x75316420] }
 0x127   : > { %3797 = vmatmul.msk.f32.vlgmr.msrb.gmra.mxu1 %vm567_vm2, %v3795_v1  ;;  %1684 = vrot.lane.b32.xlu2 %v1679_v55, %s4067_s16 }
 0x12b   : > { %v800_v2 = vpop.permute.xlu1 %799  ;;  %v1060_v20 = vpop.permute.xlu2 %1059 }
 0x12c   : > { %v805_v3 = vsel %vm803_vm4, %v798_v56, %v800_v2  ;;  %v968_v4 = vpop.permute.xlu0 %967 }
 0x12d   : > { %3798 = vmatpush.msk.msrb.mxu2 %vm571_vm1, %v805_v3  ;;  %v976_v14 = vsel %vm975_vm7, %v968_v4, %v970_v46 }
 0x12e   : > { %3799 = vmatmul.msk.f32.vlgmr.msrb.gmra.mxu2 %vm567_vm2, %v3795_v1 }
 0x12f   : > { %3806 = vmatmul.msk.f32.vlgmr.msra.gmra.mxu1 %vm567_vm2, %v3802_v5  ;;  %1767 = vrot.lane.b32.xlu2 %v4075_v52, %s4078_s13 }
 0x133   : > { %v802_v6 = vpop.permute.xlu1 %801  ;;  %v1226_v31 = vpop.permute.xlu2 %1225 }
 0x134   : > { %v714_v7 = vpop.permute.xlu0 %713  ;;  %v806_v9 = vsel %vm803_vm4, %v800_v2, %v802_v6 }
 0x135   : > { %v719_v10 = vsel %vm717_vm5, %v712_v43, %v714_v7  ;;  %v720_v11 = vsel %vm717_vm5, %v714_v7, %v716_v60 }
 0x136   : > { %3791 = vmatpush.msk.msra.mxu3 %vm571_vm1, %v719_v10  ;;  %3793 = vmatpush.msk.msrb.mxu0 %vm571_vm1, %v720_v11 }
 0x137   : > { %3792 = vmatmul.msk.f32.vlgmr.msra.gmra.mxu3 %vm567_vm2, %v3788_v61  ;;  %3794 = vmatmul.msk.f32.vlgmr.msrb.gmra.mxu0 %vm567_vm2, %v3788_v61 }
 0x138   : > { %3800 = vmatpush.msk.msrb.mxu3 %vm571_vm1, %v806_v9  ;;  %3803 = vmatpush.msk.msra.mxu0 %vm571_vm1, %v890_v12 }
 0x13a   : > { %3810 = vmatpush.msk.msra.mxu3 %vm571_vm1, %v976_v14  ;;  %3812 = vmatpush.msk.msrb.mxu0 %vm571_vm1, %v977_v13 }
 0x13b   : > { %v974_v15 = vpop.permute.xlu1 %973  ;;  %v1146_v39 = vpop.permute.xlu2 %1145 }
 0x13c   : > { %v978_v16 = vsel %vm975_vm7, %v972_v8, %v974_v15  ;;  %v888_v17 = vpop.permute.xlu0 %887 }
 0x13d   : > { %v892_v18 = vsel %vm889_vm6, %v886_v62, %v888_v17  ;;  %3814 = vmatpush.msk.msrb.mxu1 %vm571_vm1, %v978_v16 }
 0x13e   : > { %3807 = vmatpush.msk.msra.mxu2 %vm571_vm1, %v892_v18  ;;  %3815 = vmatmul.msk.f32.vlgmr.msrb.gmra.mxu1 %vm567_vm2, %v3809_v19 }
 0x13f   : > { %3801 = vmatmul.msk.f32.vlgmr.msrb.gmra.mxu3 %vm567_vm2, %v3795_v1  ;;  %3804 = vmatmul.msk.f32.vlgmr.msra.gmra.mxu0 %vm567_vm2, %v3802_v5 }
 0x140   : > { %3808 = vmatmul.msk.f32.vlgmr.msra.gmra.mxu2 %vm567_vm2, %v3802_v5  ;;  %v664_v5 = vpop.f32.mrf.mxu3 }
 0x143   : > { %v1058_v25 = vpop.permute.xlu1 %1057 }
 0x144   : > { %v1064_v26 = vsel %vm1061_vm8, %v1058_v25, %v1060_v20  ;;  %v1056_v27 = vpop.permute.xlu0 %1055 }
 0x145   : > { %v1062_v28 = vsel %vm1061_vm8, %v4331_v54, %v1056_v27  ;;  %v1063_v29 = vsel %vm1061_vm8, %v1056_v27, %v1058_v25  ;;  %3821 = vmatpush.msk.msra.mxu0 %vm571_vm1, %v1064_v26  ;;  %v1503_v54 = vld.sshfl [vmem:[#allocation1 + $0x18] sm:$0xff pattern:$0x75316420] }
 0x146   : > { %3817 = vmatpush.msk.msrb.mxu2 %vm571_vm1, %v1062_v28  ;;  %3819 = vmatpush.msk.msrb.mxu3 %vm571_vm1, %v1063_v29  ;;  %1677 = vst [vmem:[#allocation1 + $0x10] ss:$2 sm:$0xff] %v4231_v22 }
 0x147   : > { %3811 = vmatmul.msk.f32.vlgmr.msra.gmra.mxu3 %vm567_vm2, %v3809_v19  ;;  %3813 = vmatmul.msk.f32.vlgmr.msrb.gmra.mxu0 %vm567_vm2, %v3809_v19 }
 0x148   : > { %3818 = vmatmul.msk.f32.vlgmr.msrb.gmra.mxu2 %vm567_vm2, %v3816_v30  ;;  %1510 = vrot.lane.b32.xlu0 %v1503_v54, %s4068_s29 }
 0x14b   : > { %v1142_v32 = vpop.permute.xlu1 %1141 }
 0x14c   : > { %v1140_v33 = vpop.permute.xlu0 %1139 }
 0x14d   : > { %v1148_v37 = vsel %vm1147_vm9, %v1140_v33, %v1142_v32  ;;  %v1680_v57 = vld.sshfl [vmem:[#allocation1 + $0x10] sm:$0xff pattern:$0x75316420]  ;;  %v1681_v58 = vld.sshfl [vmem:[#allocation1 + $0x18] sm:$0xff pattern:$0x75316420] }
 0x14e   : > { %3824 = vmatpush.msk.msra.mxu1 %vm571_vm1, %v1148_v37  ;;  %1686 = vrot.lane.b32.xlu2 %v1680_v57, %s4067_s16  ;;  %1855 = vst [vmem:[#allocation1 + $0x10] ss:$2 sm:$0xff] %v4231_v22  ;;  %v1318_v33 = vld [vmem:[%s5058_s10] sm:$0x7] }
 0x14f   : > { %3820 = vmatmul.msk.f32.vlgmr.msrb.gmra.mxu3 %vm567_vm2, %v3816_v30  ;;  %3822 = vmatmul.msk.f32.vlgmr.msra.gmra.mxu0 %vm567_vm2, %v3816_v30 }
 0x150   : > { %3825 = vmatmul.msk.f32.vlgmr.msra.gmra.mxu1 %vm567_vm2, %v3823_v38  ;;  %1589 = vrot.lane.b32.xlu0 %v4075_v52, %s4077_s14 }
 0x153   : > { %v1144_v40 = vpop.permute.xlu1 %1143 }
 0x154   : > { %v1149_v41 = vsel %vm1147_vm9, %v1142_v32, %v1144_v40  ;;  %v1150_v42 = vsel %vm1147_vm9, %v1144_v40, %v1146_v39  ;;  %v1228_v43 = vpop.permute.xlu0 %1227  ;;  %v1313_v39 = vpop.permute.xlu2 %1312 }
 0x155   : > { %v1234_v45 = vsel %vm1233_vm10, %v1226_v31, %v1228_v43  ;;  %3826 = vmatpush.msk.msra.mxu2 %vm571_vm1, %v1149_v41  ;;  %3828 = vmatpush.msk.msra.mxu3 %vm571_vm1, %v1150_v42  ;;  %v1858_v62 = vld.sshfl [vmem:[#allocation1 + $0x10] sm:$0xff pattern:$0x75316420]  ;;  %v1859_v63 = vld.sshfl [vmem:[#allocation1 + $0x18] sm:$0xff pattern:$0x75316420] }
 0x156   : > { %3831 = vmatpush.msk.msrb.mxu0 %vm571_vm1, %v1234_v45  ;;  %3827 = vmatmul.msk.f32.vlgmr.msra.gmra.mxu2 %vm567_vm2, %v3823_v38  ;;  %2033 = vst [vmem:[#allocation1 + $0x10] ss:$2 sm:$0xff] %v4231_v22  ;;  %v1320_v45 = vperm.slane %v1318_v33, 0 }
 0x157   : > { %3829 = vmatmul.msk.f32.vlgmr.msra.gmra.mxu3 %vm567_vm2, %v3823_v38  ;;  %3832 = vmatmul.msk.f32.vlgmr.msrb.gmra.mxu0 %vm567_vm2, %v3830_v44 }
 0x158   : > { %1688 = vrot.lane.b32.xlu0 %v1681_v58, %s4067_s16  ;;  %1864 = vrot.lane.b32.xlu2 %v1858_v62, %s4069_s17  ;;  %v1321_v58 = vperm.slane %v1318_v33, 1 }
 0x15b   : > { %v1232_v46 = vpop.permute.xlu1 %1231 }
 0x15c   : > { %v1230_v47 = vpop.permute.xlu0 %1229 }
 0x15d   : > { %v1235_v48 = vsel %vm1233_vm10, %v1228_v43, %v1230_v47  ;;  %v1236_v49 = vsel %vm1233_vm10, %v1230_v47, %v1232_v46  ;;  %v2036_v54 = vld.sshfl [vmem:[#allocation1 + $0x10] sm:$0xff pattern:$0x75316420]  ;;  %v2037_v55 = vld.sshfl [vmem:[#allocation1 + $0x18] sm:$0xff pattern:$0x75316420] }
 0x15e   : > { %3833 = vmatpush.msk.msrb.mxu1 %vm571_vm1, %v1235_v48  ;;  %3835 = vmatpush.msk.msrb.mxu2 %vm571_vm1, %v1236_v49  ;;  %2211 = vst [vmem:[#allocation1 + $0x10] ss:$2 sm:$0xff] %v4231_v22 }
 0x15f   : > { %3834 = vmatmul.msk.f32.vlgmr.msrb.gmra.mxu1 %vm567_vm2, %v3830_v44  ;;  %3836 = vmatmul.msk.f32.vlgmr.msrb.gmra.mxu2 %vm567_vm2, %v3830_v44 }
 0x160   : > { %3843 = vmatpush.msk.msra.mxu2 %vm571_vm1, %v4270_v34  ;;  %v1678_v34 = vld.sshfl [vmem:[#allocation1] sm:$0xff pattern:$0x75316420]  ;;  %1866 = vrot.lane.b32.xlu0 %v1859_v63, %s4069_s17 }
 0x161   : > { %1853 = vst [vmem:[#allocation1] ss:$2 sm:$0xff] %v4229_v21  ;;  %1682 = vrot.lane.b32.xlu1 %v1678_v34, %s4067_s16  ;;  %s4080_s16 = smov 19  }
 0x168   : > { %v1857_v56 = vld.sshfl [vmem:[#allocation1 + $0x8] sm:$0xff pattern:$0x75316420]  ;;  %v1856_v61 = vld.sshfl [vmem:[#allocation1] sm:$0xff pattern:$0x75316420] }
 0x169   : > { %1862 = vrot.lane.b32.xlu1 %v1857_v56, %s4069_s17  ;;  %2031 = vst [vmem:[#allocation1] ss:$2 sm:$0xff] %v4229_v21  ;;  %1860 = vrot.lane.b32.xlu2 %v1856_v61, %s4069_s17 }
 0x170   : > { %v2035_v3 = vld.sshfl [vmem:[#allocation1 + $0x8] sm:$0xff pattern:$0x75316420]  ;;  %v2034_v6 = vld.sshfl [vmem:[#allocation1] sm:$0xff pattern:$0x75316420] }
 0x171   : > { %1945 = vrot.lane.b32.xlu1 %v4075_v52, %s4079_s15  ;;  %2040 = vrot.lane.b32.xlu0 %v2035_v3, %s4070_s30  ;;  %2209 = vst [vmem:[#allocation1] ss:$2 sm:$0xff] %v4229_v21  ;;  %v2215_v3 = vld.sshfl [vmem:[#allocation1 + $0x18] sm:$0xff pattern:$0x75316420] }
 0x172   : > { %2038 = vrot.lane.b32.xlu2 %v2034_v6, %s4070_s30 }
 0x179   : > { %2123 = vrot.lane.b32.xlu0 %v4075_v52, %s4080_s16 }
 0x194   : > { %v615_v59 = vpop.f32.mrf.mxu1  ;;  %v595_v60 = vpop.f32.mrf.mxu0 }
 0x195   : > { %v665_v13 = vadd.f32 %v664_v5, %v595_v60  ;;  %v1322_v5 = vperm.slane %v1318_v33, 2 }
 0x19c   : > { %v704_v1 = vpop.f32.mrf.mxu1 }
 0x19d   : > { %v684_v2 = vpop.f32.mrf.mxu0 }
 0x19e   : > { %v685_v23 = vadd.f32 %v684_v2, %v615_v59  ;;  %v2214_v2 = vld.sshfl [vmem:[#allocation1 + $0x10] sm:$0xff pattern:$0x75316420] }
 0x19f   : > { %2389 = vst [vmem:[#allocation1 + $0x10] ss:$2 sm:$0xff] %v4231_v22 }
 0x1a1   : > { %v635_v0 = vpop.f32.mrf.mxu2 }
 0x1a2   : > { %v705_v32 = vadd.f32 %v704_v1, %v635_v0 }
 0x1a4   : > { %v833_v7 = vpop.f32.mrf.mxu1 }
 0x1a9   : > { %v747_v4 = vpop.f32.mrf.mxu2 }
 0x1aa   : > { %v790_v15 = vadd.f32 %v747_v4, %v665_v13 }
 0x1ac   : > { %v939_v12 = vpop.f32.mrf.mxu1  ;;  %v876_v19 = vadd.f32 %v833_v7, %v790_v15  ;;  %v2213_v7 = vld.sshfl [vmem:[#allocation1 + $0x8] sm:$0xff pattern:$0x75316420] }
 0x1b1   : > { %v853_v9 = vpop.f32.mrf.mxu2 }
 0x1b4   : > { %v787_v8 = vpop.f32.mrf.mxu0 }
 0x1b5   : > { %v792_v37 = vadd.f32 %v787_v8, %v705_v32  ;;  %v2212_v8 = vld.sshfl [vmem:[#allocation1] sm:$0xff pattern:$0x75316420] }
 0x1b6   : > { %2387 = vst [vmem:[#allocation1] ss:$2 sm:$0xff] %v4229_v21 }
 0x1ba   : > { %v767_v10 = vpop.f32.mrf.mxu3 }
 0x1bb   : > { %v1045_v18 = vpop.f32.mrf.mxu1  ;;  %v791_v26 = vadd.f32 %v767_v10, %v685_v23  ;;  %v2393_v10 = vld.sshfl [vmem:[#allocation1 + $0x18] sm:$0xff pattern:$0x75316420] }
 0x1bc   : > { %v919_v11 = vpop.f32.mrf.mxu0 }
 0x1bd   : > { %v962_v20 = vadd.f32 %v919_v11, %v876_v19  ;;  %v877_v30 = vadd.f32 %v853_v9, %v791_v26  ;;  %v2392_v9 = vld.sshfl [vmem:[#allocation1 + $0x10] sm:$0xff pattern:$0x75316420]  ;;  %v4490_v11 = vpop.permute.xlu2 %1508 }
 0x1be   : > { %2567 = vst [vmem:[#allocation1 + $0x10] ss:$2 sm:$0xff] %v4231_v22 }
 0x1bf   : > { %v963_v40 = vadd.f32 %v939_v12, %v877_v30  ;;  %v4498_v12 = vpop.permute.xlu1 %1506 }
 0x1c0   : > { %v1513_v13 = vsel %vm563_vm3, %v4498_v12, %v4490_v11 }
 0x1c1   : > { %3852 = vmatpush.msk.msrb.mxu2 %vm571_vm1, %v1513_v13 }
 0x1c2   : > { %v873_v14 = vpop.f32.mrf.mxu3 }
 0x1c3   : > { %v959_v16 = vpop.f32.mrf.mxu2  ;;  %v878_v43 = vadd.f32 %v873_v14, %v792_v37 }
 0x1c4   : > { %v1025_v17 = vpop.f32.mrf.mxu0 }
 0x1c5   : > { %v1049_v46 = vadd.f32 %v1025_v17, %v963_v40  ;;  %v964_v49 = vadd.f32 %v959_v16, %v878_v43  ;;  %v4504_v14 = vpop.permute.xlu2 %1684  ;;  %v2390_v16 = vld.sshfl [vmem:[#allocation1] sm:$0xff pattern:$0x75316420]  ;;  %v2391_v17 = vld.sshfl [vmem:[#allocation1 + $0x8] sm:$0xff pattern:$0x75316420] }
 0x1c6   : > { %2565 = vst [vmem:[#allocation1] ss:$2 sm:$0xff] %v4229_v21  ;;  %v2571_v26 = vld.sshfl [vmem:[#allocation1 + $0x18] sm:$0xff pattern:$0x75316420] }
 0x1c7   : > { %v1050_v56 = vadd.f32 %v1045_v18, %v964_v49  ;;  %v4516_v18 = vpop.permute.xlu0 %1337  ;;  %v4531_v23 = vpop.permute.xlu1 %1504  ;;  %v1331_v40 = vld [vmem:[%s5053_s5] sm:$0xf] }
 0x1c8   : > { %3844 = vmatmul.msk.f32.vlgmr.msra.gmra.mxu2 %vm567_vm2, %v1331_v40 }
 0x1ca   : > { %v1005_v24 = vpop.f32.mrf.mxu3 }
 0x1cb   : > { %v1048_v25 = vadd.f32 %v1005_v24, %v962_v20  ;;  %v1091_v27 = vpop.f32.mrf.mxu2 }
 0x1cc   : > { %v1131_v28 = vpop.f32.mrf.mxu0 }
 0x1cd   : > { %v1134_v29 = vadd.f32 %v1091_v27, %v1048_v25  ;;  %v1177_v31 = vpop.f32.mrf.mxu1  ;;  %v1136_v60 = vadd.f32 %v1131_v28, %v1050_v56  ;;  %v4512_v15 = vpop.permute.xlu2 %1767  ;;  %v2570_v27 = vld.sshfl [vmem:[#allocation1 + $0x10] sm:$0xff pattern:$0x75316420]  ;;  %v2569_v28 = vld.sshfl [vmem:[#allocation1 + $0x8] sm:$0xff pattern:$0x75316420] }
 0x1ce   : > { %2745 = vst [vmem:[#allocation1 + $0x10] ss:$2 sm:$0xff] %v4231_v22 }
 0x1cf   : > { %v1220_v38 = vadd.f32 %v1177_v31, %v1134_v29  ;;  %v4525_v20 = vpop.permute.xlu0 %1510  ;;  %v2568_v29 = vld.sshfl [vmem:[#allocation1] sm:$0xff pattern:$0x75316420] }
 0x1d0   : > { %2743 = vst [vmem:[#allocation1] ss:$2 sm:$0xff] %v4229_v21  ;;  %v1514_v56 = vsel %vm563_vm3, %v4490_v11, %v4525_v20 }
 0x1d2   : > { %v1111_v41 = vpop.f32.mrf.mxu3 }
 0x1d3   : > { %v1135_v48 = vadd.f32 %v1111_v41, %v1049_v46  ;;  %v1683_v30 = vpop.permute.xlu1 %1682 }
 0x1d4   : > { %v1263_v42 = vpop.f32.mrf.mxu0 }
 0x1d5   : > { %v1306_v44 = vadd.f32 %v1263_v42, %v1220_v38  ;;  %v4523_v19 = vpop.permute.xlu2 %1686  ;;  %v4587_v42 = vld [vmem:[%s5053_s5 + $0x4] sm:$0xf]  ;;  %v2749_v46 = vld.sshfl [vmem:[#allocation1 + $0x18] sm:$0xff pattern:$0x75316420] }
 0x1d6   : > { %3853 = vmatmul.msk.f32.vlgmr.msrb.gmra.mxu2 %vm567_vm2, %v4587_v42 }
 0x1d7   : > { %v1315_v47 = vadd.f32 %v1313_v39, %v1306_v44  ;;  %v4539_v25 = vpop.permute.xlu0 %1589  ;;  %v2747_v43 = vld.sshfl [vmem:[#allocation1 + $0x8] sm:$0xff pattern:$0x75316420] }
 0x1d9   : > { %v4462_v50 = vmul.f32 %v1320_v45, %v1315_v47  ;;  %v1197_v51 = vpop.f32.mrf.mxu2  ;;  %v2746_v47 = vld.sshfl [vmem:[#allocation1] sm:$0xff pattern:$0x75316420] }
 0x1da   : > { %v1221_v53 = vadd.f32 %v1197_v51, %v1135_v48  ;;  %v1217_v59 = vpop.f32.mrf.mxu3  ;;  %v2748_v48 = vld.sshfl [vmem:[#allocation1 + $0x10] sm:$0xff pattern:$0x75316420] }
 0x1db   : > { %1947 = vrot.lane.b32.xlu2 %v4462_v50, %s4079_s15  ;;  %1769 = vrot.lane.b32.xlu0 %v4462_v50, %s4078_s13  ;;  %v1222_v62 = vadd.f32 %v1217_v59, %v1136_v60  ;;  %v4554_v33 = vpop.permute.xlu1 %1862 }
 0x1dc   : > { %1339 = vrot.lane.b32.xlu1 %v4462_v50, %s4076_s28  ;;  %v1283_v34 = vpop.f32.mrf.mxu1 }
 0x1dd   : > { %v1307_v57 = vadd.f32 %v1283_v34, %v1221_v53  ;;  %v4533_v24 = vpop.permute.xlu2 %1864  ;;  %v1332_v53 = vld [vmem:[%s5054_s6] sm:$0xf] }
 0x1de   : > { %v1869_v13 = vsel %vm803_vm4, %v4554_v33, %v4533_v24 }
 0x1df   : > { %v1316_v61 = vadd.f32 %v1313_v39, %v1307_v57  ;;  %v4552_v32 = vpop.permute.xlu0 %1688 }
 0x1e0   : > { %v1692_v11 = vsel %vm717_vm5, %v4523_v19, %v4552_v32 }
 0x1e1   : > { %v4471_v63 = vmul.f32 %v1321_v58, %v1316_v61 }
 0x1e2   : > { %v1303_v0 = vpop.f32.mrf.mxu2 }
 0x1e3   : > { %v1308_v1 = vadd.f32 %v1303_v0, %v1222_v62  ;;  %1341 = vrot.lane.b32.xlu2 %v4471_v63, %s4076_s28  ;;  %1949 = vrot.lane.b32.xlu0 %v4471_v63, %s4079_s15  ;;  %v1946_v37 = vpop.permute.xlu1 %1945 }
 0x1e4   : > { %1591 = vrot.lane.b32.xlu1 %v4462_v50, %s4077_s14 }
 0x1e5   : > { %v1317_v4 = vadd.f32 %v1313_v39, %v1308_v1  ;;  %v4545_v31 = vpop.permute.xlu2 %1860  ;;  %v1512_v1 = vsel %vm563_vm3, %v4531_v23, %v4498_v12 }
 0x1e7   : > { %v4480_v6 = vmul.f32 %v1322_v5, %v1317_v4  ;;  %v4562_v22 = vpop.permute.xlu0 %1866 }
 0x1eb   : > { %1593 = vrot.lane.b32.xlu2 %v4471_v63, %s4077_s14  ;;  %1343 = vrot.lane.b32.xlu0 %v4480_v6, %s4076_s28 }
 0x1ec   : > { %2125 = vrot.lane.b32.xlu1 %v4462_v50, %s4080_s16 }
 0x1ed   : > { %v4558_v21 = vpop.permute.xlu2 %2038 }
 0x1ef   : > { %v4578_v41 = vpop.permute.xlu0 %2040 }
 0x1f0   : > { %v2046_v20 = vsel %vm889_vm6, %v4558_v21, %v4578_v41 }
 0x1f3   : > { %2127 = vrot.lane.b32.xlu2 %v4471_v63, %s4080_s16  ;;  %1595 = vrot.lane.b32.xlu0 %v4480_v6, %s4077_s14  ;;  %s4085_s14 = smov 111  }
 0x1f4   : > { %1771 = vrot.lane.b32.xlu1 %v4471_v63, %s4078_s13 }
 0x1f7   : > { %v4592_v44 = vpop.permute.xlu0 %2123 }
 0x1fb   : > { %2218 = vrot.lane.b32.xlu2 %v2213_v7, %s4066_s24  ;;  %2042 = vrot.lane.b32.xlu0 %v2036_v54, %s4070_s30 }
 0x1fc   : > { %2044 = vrot.lane.b32.xlu1 %v2037_v55, %s4070_s30 }
 0x203   : > { %2301 = vrot.lane.b32.xlu2 %v4075_v52, %s4081_s26  ;;  %2220 = vrot.lane.b32.xlu0 %v2214_v2, %s4066_s24 }
 0x204   : > { %2222 = vrot.lane.b32.xlu1 %v2215_v3, %s4066_s24  ;;  %v3856_v3 = vld [vmem:[%s5054_s6 + $0x4] sm:$0xf] }
 0x20b   : > { %2481 = vrot.lane.b32.xlu2 %v4462_v50, %s4082_s27  ;;  %2216 = vrot.lane.b32.xlu0 %v2212_v8, %s4066_s24  ;;  %s4083_s24 = smov 1  }
 0x20c   : > { %2305 = vrot.lane.b32.xlu1 %v4471_v63, %s4081_s26 }
 0x213   : > { %2400 = vrot.lane.b32.xlu2 %v2393_v10, %s4071_s18  ;;  %2394 = vrot.lane.b32.xlu0 %v2390_v16, %s4071_s18 }
 0x214   : > { %1773 = vrot.lane.b32.xlu1 %v4480_v6, %s4078_s13 }
 0x21b   : > { %2129 = vrot.lane.b32.xlu2 %v4480_v6, %s4080_s16  ;;  %2303 = vrot.lane.b32.xlu0 %v4462_v50, %s4081_s26 }
 0x21c   : > { %1951 = vrot.lane.b32.xlu1 %v4480_v6, %s4079_s15 }
 0x223   : > { %2307 = vrot.lane.b32.xlu2 %v4480_v6, %s4081_s26  ;;  %2483 = vrot.lane.b32.xlu0 %v4471_v63, %s4082_s27 }
 0x224   : > { %2396 = vrot.lane.b32.xlu1 %v2391_v17, %s4071_s18 }
 0x22b   : > { %2578 = vrot.lane.b32.xlu2 %v2571_v26, %s4072_s19  ;;  %2574 = vrot.lane.b32.xlu0 %v2569_v28, %s4072_s19 }
 0x22c   : > { %2479 = vrot.lane.b32.xlu1 %v4075_v52, %s4082_s27 }
 0x233   : > { %2661 = vrot.lane.b32.xlu2 %v4471_v63, %s4083_s24  ;;  %2485 = vrot.lane.b32.xlu0 %v4480_v6, %s4082_s27 }
 0x234   : > { %2398 = vrot.lane.b32.xlu1 %v2392_v9, %s4071_s18  ;;  %v3863_v9 = vld [vmem:[%s5053_s5 + $0x8] sm:$0xf] }
 0x235   : > { %v4569_v38 = vpop.permute.xlu2 %1947 }
 0x236   : > { %v4573_v39 = vsel %vm1953_vm11, %v1946_v37, %v4569_v38  ;;  %v3884_v37 = vld [vmem:[%s5054_s6 + $0xc] sm:$0xf] }
 0x23b   : > { %2663 = vrot.lane.b32.xlu0 %v4480_v6, %s4083_s24  ;;  %2752 = vrot.lane.b32.xlu2 %v2747_v43, %s4073_s20 }
 0x23c   : > { %2576 = vrot.lane.b32.xlu1 %v2570_v27, %s4072_s19 }
 0x23d   : > { %v1342_v45 = vpop.permute.xlu2 %1341 }
 0x243   : > { %2657 = vrot.lane.b32.xlu0 %v4075_v52, %s4083_s24  ;;  %2754 = vrot.lane.b32.xlu2 %v2748_v48, %s4073_s20 }
 0x244   : > { %2572 = vrot.lane.b32.xlu1 %v2568_v29, %s4072_s19 }
 0x245   : > { %v1594_v34 = vpop.permute.xlu2 %1593 }
 0x24b   : > { %2756 = vrot.lane.b32.xlu0 %v2749_v46, %s4073_s20 }
 0x24c   : > { %2750 = vrot.lane.b32.xlu1 %v2746_v47, %s4073_s20 }
 0x24d   : > { %v1770_v49 = vpop.permute.xlu0 %1769  ;;  %v4632_v60 = vpop.permute.xlu2 %2127 }
 0x24e   : > { %v1340_v51 = vpop.permute.xlu1 %1339  ;;  %v1776_v12 = vsel %vm1775_vm14, %v4512_v15, %v1770_v49 }
 0x24f   : > { %v1346_v54 = vsel %vm1345_vm12, %v4516_v18, %v1340_v51  ;;  %v1347_v55 = vsel %vm1345_vm12, %v1340_v51, %v1342_v45  ;;  %v3870_v18 = vld [vmem:[%s5054_s6 + $0x8] sm:$0xf] }
 0x250   : > { %3837 = vmatpush.msk.msrb.mxu3 %vm571_vm1, %v1346_v54  ;;  %3839 = vmatpush.msk.msra.mxu0 %vm571_vm1, %v1347_v55 }
 0x251   : > { %3838 = vmatmul.msk.f32.vlgmr.msrb.gmra.mxu3 %vm567_vm2, %v1332_v53  ;;  %3840 = vmatmul.msk.f32.vlgmr.msra.gmra.mxu0 %vm567_vm2, %v1332_v53 }
 0x252   : > { %3845 = vmatpush.msk.msra.mxu3 %vm571_vm1, %v4272_v35  ;;  %3847 = vmatpush.msk.msrb.mxu0 %vm571_vm1, %v4274_v36  ;;  %v1691_v35 = vsel %vm717_vm5, %v4504_v14, %v4523_v19  ;;  %v1690_v36 = vsel %vm717_vm5, %v1683_v30, %v4504_v14  ;;  %v1870_v14 = vsel %vm803_vm4, %v4533_v24, %v4562_v22  ;;  %vm2487_vm5 = vcmask 15360  }
 0x253   : > { %v1868_v19 = vsel %vm803_vm4, %v4545_v31, %v4554_v33  ;;  %v3891_v31 = vld [vmem:[%s5053_s5 + $0x10] sm:$0xf] }
 0x254   : > { %3854 = vmatpush.msk.msrb.mxu3 %vm571_vm1, %v1514_v56  ;;  %2659 = vrot.lane.b32.xlu1 %v4462_v50, %s4083_s24 }
 0x255   : > { %v4620_v57 = vpop.permute.xlu0 %1949  ;;  %v4653_v4 = vpop.permute.xlu2 %2218 }
 0x256   : > { %v1592_v58 = vpop.permute.xlu1 %1591  ;;  %v1955_v27 = vsel %vm1953_vm11, %v4569_v38, %v4620_v57 }
 0x257   : > { %v1598_v59 = vsel %vm1597_vm13, %v4539_v25, %v1592_v58  ;;  %v1599_v2 = vsel %vm1597_vm13, %v1592_v58, %v1594_v34  ;;  %v3877_v25 = vld [vmem:[%s5053_s5 + $0xc] sm:$0xf] }
 0x258   : > { %3857 = vmatpush.msk.msra.mxu0 %vm571_vm1, %v1598_v59 }
 0x259   : > { %3846 = vmatmul.msk.f32.vlgmr.msra.gmra.mxu3 %vm567_vm2, %v1331_v40  ;;  %3848 = vmatmul.msk.f32.vlgmr.msrb.gmra.mxu0 %vm567_vm2, %v1331_v40 }
 0x25a   : > { %3864 = vmatpush.msk.msra.mxu3 %vm571_vm1, %v1690_v36  ;;  %3866 = vmatpush.msk.msrb.mxu0 %vm571_vm1, %v1691_v35  ;;  %v3919_v36 = vld [vmem:[%s5053_s5 + $0x18] sm:$0xf] }
 0x25d   : > { %v1344_v61 = vpop.permute.xlu0 %1343  ;;  %v4682_v16 = vpop.permute.xlu2 %2301 }
 0x25e   : > { %v1348_v62 = vsel %vm1345_vm12, %v1342_v45, %v1344_v61  ;;  %v4637_v0 = vpop.permute.xlu1 %2125  ;;  %v3912_v61 = vld [vmem:[%s5054_s6 + $0x14] sm:$0xf] }
 0x25f   : > { %3841 = vmatpush.msk.msra.mxu1 %vm571_vm1, %v1348_v62  ;;  %v2133_v28 = vsel %vm2131_vm15, %v4637_v0, %v4632_v60 }
 0x260   : > { %3842 = vmatmul.msk.f32.vlgmr.msra.gmra.mxu1 %vm567_vm2, %v1332_v53  ;;  %v3905_v53 = vld [vmem:[%s5053_s5 + $0x14] sm:$0xf] }
 0x261   : > { %3850 = vmatpush.msk.msrb.mxu1 %vm571_vm1, %v1512_v1  ;;  %3855 = vmatmul.msk.f32.vlgmr.msrb.gmra.mxu3 %vm567_vm2, %v4587_v42  ;;  %v3926_v1 = vld [vmem:[%s5054_s6 + $0x18] sm:$0xf] }
 0x262   : > { %3858 = vmatmul.msk.f32.vlgmr.msra.gmra.mxu0 %vm567_vm2, %v3856_v3 }
 0x263   : > { %3859 = vmatpush.msk.msra.mxu1 %vm571_vm1, %v1599_v2 }
 0x265   : > { %v1596_v5 = vpop.permute.xlu0 %1595  ;;  %v4701_v26 = vpop.permute.xlu2 %2481 }
 0x266   : > { %v1600_v7 = vsel %vm1597_vm13, %v1594_v34, %v1596_v5  ;;  %v1772_v8 = vpop.permute.xlu1 %1771 }
 0x267   : > { %v1777_v10 = vsel %vm1775_vm14, %v1770_v49, %v1772_v8  ;;  %3861 = vmatpush.msk.msra.mxu2 %vm571_vm1, %v1600_v7 }
 0x268   : > { %3873 = vmatpush.msk.msrb.mxu3 %vm571_vm1, %v1777_v10  ;;  %3851 = vmatmul.msk.f32.vlgmr.msrb.gmra.mxu1 %vm567_vm2, %v4587_v42  ;;  %v3898_v42 = vld [vmem:[%s5054_s6 + $0x10] sm:$0xf] }
 0x269   : > { %3862 = vmatmul.msk.f32.vlgmr.msra.gmra.mxu2 %vm567_vm2, %v3856_v3  ;;  %3865 = vmatmul.msk.f32.vlgmr.msra.gmra.mxu3 %vm567_vm2, %v3863_v9 }
 0x26a   : > { %3868 = vmatpush.msk.msrb.mxu1 %vm571_vm1, %v1692_v11  ;;  %3871 = vmatpush.msk.msrb.mxu2 %vm571_vm1, %v1776_v12 }
 0x26b   : > { %3882 = vmatpush.msk.msra.mxu3 %vm571_vm1, %v1870_v14  ;;  %3867 = vmatmul.msk.f32.vlgmr.msrb.gmra.mxu0 %vm567_vm2, %v3863_v9 }
 0x26c   : > { %3880 = vmatpush.msk.msra.mxu2 %vm571_vm1, %v1869_v13 }
 0x26d   : > { %v2043_v15 = vpop.permute.xlu0 %2042  ;;  %v4722_v21 = vpop.permute.xlu2 %2400 }
 0x26e   : > { %v2045_v17 = vpop.permute.xlu1 %2044  ;;  %v2047_v45 = vsel %vm889_vm6, %v4578_v41, %v2043_v15 }
 0x26f   : > { %v2048_v32 = vsel %vm889_vm6, %v2043_v15, %v2045_v17  ;;  %v3933_v15 = vld [vmem:[%s5053_s5 + $0x1c] sm:$0xf] }
 0x270   : > { %3860 = vmatmul.msk.f32.vlgmr.msra.gmra.mxu1 %vm567_vm2, %v3856_v3 }
 0x271   : > { %3872 = vmatmul.msk.f32.vlgmr.msrb.gmra.mxu2 %vm567_vm2, %v3870_v18  ;;  %3874 = vmatmul.msk.f32.vlgmr.msrb.gmra.mxu3 %vm567_vm2, %v3870_v18 }
 0x272   : > { %3878 = vmatpush.msk.msra.mxu1 %vm571_vm1, %v1868_v19  ;;  %3892 = vmatpush.msk.msrb.mxu3 %vm571_vm1, %v2046_v20  ;;  %v2907_v19 = vld [vmem:[%s5055_s7] sm:$0xf] }
 0x273   : > { %2910 = vperm.xlu1 %4056, %v2907_v19  }
 0x275   : > { %v2221_v23 = vpop.permute.xlu0 %2220  ;;  %v2130_v46 = vpop.permute.xlu2 %2129 }
 0x276   : > { %v2223_v24 = vpop.permute.xlu1 %2222  ;;  %v2134_v41 = vsel %vm2131_vm15, %v4632_v60, %v2130_v46  ;;  %v2225_v54 = vsel %vm975_vm7, %v4653_v4, %v2221_v23 }
 0x277   : > { %v2226_v33 = vsel %vm975_vm7, %v2221_v23, %v2223_v24 }
 0x278   : > { %3869 = vmatmul.msk.f32.vlgmr.msrb.gmra.mxu1 %vm567_vm2, %v3863_v9 }
 0x279   : > { %3881 = vmatmul.msk.f32.vlgmr.msra.gmra.mxu2 %vm567_vm2, %v3877_v25  ;;  %3883 = vmatmul.msk.f32.vlgmr.msra.gmra.mxu3 %vm567_vm2, %v3877_v25 }
 0x27a   : > { %3887 = vmatpush.msk.msrb.mxu1 %vm571_vm1, %v1955_v27  ;;  %3901 = vmatpush.msk.msra.mxu3 %vm571_vm1, %v2133_v28  ;;  %v3947_v27 = vld [vmem:[%s5053_s5 + $0x20] sm:$0xf] }
 0x27b   : > { %3094 = vrot.lane.b32.xlu1 %v4075_v52, %s4084_s25 }
 0x27d   : > { %v2217_v29 = vpop.permute.xlu0 %2216  ;;  %v2308_v34 = vpop.permute.xlu2 %2307 }
 0x27e   : > { %v2306_v30 = vpop.permute.xlu1 %2305  ;;  %v2224_v43 = vsel %vm975_vm7, %v2217_v29, %v4653_v4  ;;  %vm2665_vm7 = vcmask 7168  }
 0x27f   : > { %v2312_v59 = vsel %vm2309_vm0, %v2306_v30, %v2308_v34 }
 0x280   : > { %3879 = vmatmul.msk.f32.vlgmr.msra.gmra.mxu1 %vm567_vm2, %v3877_v25 }
 0x281   : > { %3893 = vmatmul.msk.f32.vlgmr.msrb.gmra.mxu3 %vm567_vm2, %v3891_v31  ;;  %3896 = vmatpush.msk.msra.mxu1 %vm571_vm1, %v2048_v32  ;;  %v3954_v32 = vld [vmem:[%s5054_s6 + $0x20] sm:$0xf] }
 0x282   : > { %3910 = vmatpush.msk.msrb.mxu3 %vm571_vm1, %v2226_v33 }
 0x285   : > { %v2395_v22 = vpop.permute.xlu0 %2394  ;;  %v2579_v2 = vpop.permute.xlu2 %2578 }
 0x286   : > { %v1774_v38 = vpop.permute.xlu1 %1773 }
 0x287   : > { %v1778_v40 = vsel %vm1775_vm14, %v1772_v8, %v1774_v38 }
 0x288   : > { %3875 = vmatpush.msk.msra.mxu0 %vm571_vm1, %v1778_v40  ;;  %3888 = vmatmul.msk.f32.vlgmr.msrb.gmra.mxu1 %vm567_vm2, %v3884_v37 }
 0x289   : > { %3876 = vmatmul.msk.f32.vlgmr.msra.gmra.mxu0 %vm567_vm2, %v3870_v18  ;;  %3906 = vmatpush.msk.msrb.mxu1 %vm571_vm1, %v2224_v43 }
 0x28a   : > { %3885 = vmatpush.msk.msrb.mxu0 %vm571_vm1, %v4573_v39  ;;  %3902 = vmatmul.msk.f32.vlgmr.msra.gmra.mxu3 %vm567_vm2, %v3898_v42  ;;  %v2132_v39 = vsel %vm2131_vm15, %v4592_v44, %v4637_v0 }
 0x28c   : > { %3894 = vmatpush.msk.msra.mxu0 %vm571_vm1, %v2047_v45 }
 0x28d   : > { %v2304_v47 = vpop.permute.xlu0 %2303  ;;  %v2662_v10 = vpop.permute.xlu2 %2661 }
 0x28e   : > { %v1952_v48 = vpop.permute.xlu1 %1951  ;;  %v2311_v51 = vsel %vm2309_vm0, %v2304_v47, %v2306_v30  ;;  %v2310_v35 = vsel %vm2309_vm0, %v4682_v16, %v2304_v47 }
 0x28f   : > { %v1956_v49 = vsel %vm1953_vm11, %v4620_v57, %v1952_v48 }
 0x290   : > { %3889 = vmatpush.msk.msrb.mxu2 %vm571_vm1, %v1956_v49  ;;  %3897 = vmatmul.msk.f32.vlgmr.msra.gmra.mxu1 %vm567_vm2, %v3891_v31 }
 0x291   : > { %3886 = vmatmul.msk.f32.vlgmr.msrb.gmra.mxu0 %vm567_vm2, %v3884_v37  ;;  %3890 = vmatmul.msk.f32.vlgmr.msrb.gmra.mxu2 %vm567_vm2, %v3884_v37  ;;  %v1452_v37 = vpop.f32.mrf.mxu2 }
 0x292   : > { %3899 = vmatpush.msk.msra.mxu2 %vm571_vm1, %v2132_v39  ;;  %3903 = vmatpush.msk.msrb.mxu0 %vm571_vm1, %v2134_v41 }
 0x293   : > { %3915 = vmatpush.msk.msra.mxu1 %vm571_vm1, %v2311_v51  ;;  %3911 = vmatmul.msk.f32.vlgmr.msrb.gmra.mxu3 %vm567_vm2, %v3905_v53 }
 0x294   : > { %3908 = vmatpush.msk.msrb.mxu2 %vm571_vm1, %v2225_v54 }
 0x295   : > { %v2484_v55 = vpop.permute.xlu0 %2483  ;;  %v2753_v20 = vpop.permute.xlu2 %2752 }
 0x296   : > { %v2397_v56 = vpop.permute.xlu1 %2396  ;;  %v2489_v58 = vsel %vm2487_vm5, %v4701_v26, %v2484_v55 }
 0x297   : > { %v2402_v57 = vsel %vm1061_vm8, %v2395_v22, %v2397_v56 }
 0x298   : > { %3920 = vmatpush.msk.msra.mxu3 %vm571_vm1, %v2402_v57  ;;  %3907 = vmatmul.msk.f32.vlgmr.msrb.gmra.mxu1 %vm567_vm2, %v3905_v53 }
 0x299   : > { %3895 = vmatmul.msk.f32.vlgmr.msra.gmra.mxu0 %vm567_vm2, %v3891_v31  ;;  %3900 = vmatmul.msk.f32.vlgmr.msra.gmra.mxu2 %vm567_vm2, %v3898_v42  ;;  %v1561_v46 = vpop.f32.mrf.mxu2 }
 0x29a   : > { %3913 = vmatpush.msk.msra.mxu0 %vm571_vm1, %v2310_v35  ;;  %3917 = vmatpush.msk.msra.mxu2 %vm571_vm1, %v2312_v59 }
 0x29b   : > { %3929 = vmatpush.msk.msrb.mxu3 %vm571_vm1, %v2489_v58 }
 0x29c   : > { %3921 = vmatmul.msk.f32.vlgmr.msra.gmra.mxu3 %vm567_vm2, %v3919_v36 }
 0x29d   : > { %v2575_v60 = vpop.permute.xlu0 %2574 }
 0x29e   : > { %v2480_v62 = vpop.permute.xlu1 %2479 }
 0x29f   : > { %v2488_v0 = vsel %vm2487_vm5, %v2480_v62, %v4701_v26  ;;  %v3940_v26 = vld [vmem:[%s5054_s6 + $0x1c] sm:$0xf] }
 0x2a0   : > { %3916 = vmatmul.msk.f32.vlgmr.msra.gmra.mxu1 %vm567_vm2, %v3912_v61 }
 0x2a1   : > { %3904 = vmatmul.msk.f32.vlgmr.msrb.gmra.mxu0 %vm567_vm2, %v3898_v42  ;;  %3909 = vmatmul.msk.f32.vlgmr.msrb.gmra.mxu2 %vm567_vm2, %v3905_v53 }
 0x2a2   : > { %3927 = vmatpush.msk.msrb.mxu2 %vm571_vm1, %v2488_v0 }
 0x2a4   : > { %3930 = vmatmul.msk.f32.vlgmr.msrb.gmra.mxu3 %vm567_vm2, %v3926_v1 }
 0x2a5   : > { %v2486_v3 = vpop.permute.xlu0 %2485 }
 0x2a6   : > { %v2399_v4 = vpop.permute.xlu1 %2398  ;;  %v2490_v5 = vsel %vm2487_vm5, %v2484_v55, %v2486_v3 }
 0x2a7   : > { %v2403_v7 = vsel %vm1061_vm8, %v2397_v56, %v2399_v4  ;;  %v2404_v8 = vsel %vm1061_vm8, %v2399_v4, %v4722_v21  ;;  %vm3102_vm8 = vcmask 138240  }
 0x2a8   : > { %3922 = vmatpush.msk.msrb.mxu0 %vm571_vm1, %v2403_v7  ;;  %3924 = vmatpush.msk.msrb.mxu1 %vm571_vm1, %v2404_v8 }
 0x2a9   : > { %3914 = vmatmul.msk.f32.vlgmr.msra.gmra.mxu0 %vm567_vm2, %v3912_v61  ;;  %3918 = vmatmul.msk.f32.vlgmr.msra.gmra.mxu2 %vm567_vm2, %v3912_v61 }
 0x2aa   : > { %3931 = vmatpush.msk.msra.mxu0 %vm571_vm1, %v2490_v5  ;;  %3925 = vmatmul.msk.f32.vlgmr.msrb.gmra.mxu1 %vm567_vm2, %v3919_v36 }
 0x2ad   : > { %v2664_v9 = vpop.permute.xlu0 %2663 }
 0x2ae   : > { %v2577_v11 = vpop.permute.xlu1 %2576  ;;  %v2668_v12 = vsel %vm2665_vm7, %v2662_v10, %v2664_v9 }
 0x2af   : > { %v2581_v13 = vsel %vm1147_vm9, %v2575_v60, %v2577_v11  ;;  %v2582_v14 = vsel %vm1147_vm9, %v2577_v11, %v2579_v2 }
 0x2b0   : > { %3936 = vmatpush.msk.msra.mxu2 %vm571_vm1, %v2581_v13  ;;  %3938 = vmatpush.msk.msra.mxu3 %vm571_vm1, %v2582_v14 }
 0x2b1   : > { %3923 = vmatmul.msk.f32.vlgmr.msrb.gmra.mxu0 %vm567_vm2, %v3919_v36  ;;  %3928 = vmatmul.msk.f32.vlgmr.msrb.gmra.mxu2 %vm567_vm2, %v3926_v1 }
 0x2b2   : > { %3945 = vmatpush.msk.msrb.mxu2 %vm571_vm1, %v2668_v12  ;;  %3939 = vmatmul.msk.f32.vlgmr.msra.gmra.mxu3 %vm567_vm2, %v3933_v15 }
 0x2b5   : > { %v4828_v23 = vpop.permute.xlu0 %2657 }
 0x2b6   : > { %v2573_v17 = vpop.permute.xlu1 %2572 }
 0x2b7   : > { %v2580_v18 = vsel %vm1147_vm9, %v2573_v17, %v2575_v60  ;;  %vm3430_vm9 = vcmask 908288  }
 0x2b8   : > { %3934 = vmatpush.msk.msra.mxu1 %vm571_vm1, %v2580_v18 }
 0x2b9   : > { %3932 = vmatmul.msk.f32.vlgmr.msra.gmra.mxu0 %vm567_vm2, %v3926_v1  ;;  %3935 = vmatmul.msk.f32.vlgmr.msra.gmra.mxu1 %vm567_vm2, %v3933_v15 }
 0x2ba   : > { %3937 = vmatmul.msk.f32.vlgmr.msra.gmra.mxu2 %vm567_vm2, %v3933_v15 }
 0x2bb   : > { %3955 = vmatpush.msk.msra.mxu2 %vm571_vm1, %v4462_v50  ;;  %v2755_v50 = vpop.permute.xlu2 %2754 }
 0x2bd   : > { %v2757_v29 = vpop.permute.xlu0 %2756 }
 0x2be   : > { %v2751_v24 = vpop.permute.xlu1 %2750  ;;  %v2760_v33 = vsel %vm1233_vm10, %v2755_v50, %v2757_v29 }
 0x2bf   : > { %v2758_v25 = vsel %vm1233_vm10, %v2751_v24, %v2753_v20 }
 0x2c0   : > { %3948 = vmatpush.msk.msrb.mxu3 %vm571_vm1, %v2758_v25 }
 0x2c1   : > { %3949 = vmatmul.msk.f32.vlgmr.msrb.gmra.mxu3 %vm567_vm2, %v3947_v27 }
 0x2c2   : > { %3957 = vmatpush.msk.msra.mxu3 %vm571_vm1, %v4471_v63  ;;  %3946 = vmatmul.msk.f32.vlgmr.msrb.gmra.mxu2 %vm567_vm2, %v3940_v26  ;;  %v2759_v63 = vsel %vm1233_vm10, %v2753_v20, %v2755_v50 }
 0x2c6   : > { %v2660_v28 = vpop.permute.xlu1 %2659 }
 0x2c7   : > { %v2666_v30 = vsel %vm2665_vm7, %v4828_v23, %v2660_v28  ;;  %v2667_v31 = vsel %vm2665_vm7, %v2660_v28, %v2662_v10 }
 0x2c8   : > { %3941 = vmatpush.msk.msrb.mxu0 %vm571_vm1, %v2666_v30  ;;  %3943 = vmatpush.msk.msrb.mxu1 %vm571_vm1, %v2667_v31 }
 0x2c9   : > { %3942 = vmatmul.msk.f32.vlgmr.msrb.gmra.mxu0 %vm567_vm2, %v3940_v26  ;;  %3944 = vmatmul.msk.f32.vlgmr.msrb.gmra.mxu1 %vm567_vm2, %v3940_v26 }
 0x2ca   : > { %3950 = vmatpush.msk.msra.mxu0 %vm571_vm1, %v2759_v63  ;;  %3956 = vmatmul.msk.f32.vlgmr.msra.gmra.mxu2 %vm567_vm2, %v3954_v32 }
 0x2cb   : > { %3958 = vmatmul.msk.f32.vlgmr.msra.gmra.mxu3 %vm567_vm2, %v3954_v32  ;;  %3952 = vmatpush.msk.msra.mxu1 %vm571_vm1, %v2760_v33 }
 0x2cc   : > { %3959 = vmatpush.msk.msrb.mxu0 %vm571_vm1, %v4480_v6 }
 0x2ce   : > { %v1395_v21 = vpop.f32.mrf.mxu0 }
 0x2d1   : > { %3951 = vmatmul.msk.f32.vlgmr.msra.gmra.mxu0 %vm567_vm2, %v3947_v27  ;;  %3953 = vmatmul.msk.f32.vlgmr.msra.gmra.mxu1 %vm567_vm2, %v3947_v27 }
 0x2d4   : > { %v1375_v22 = vpop.f32.mrf.mxu3 }
 0x2d5   : > { %v1453_v38 = vadd.f32 %v1452_v37, %v1375_v22 }
 0x2d6   : > { %v1492_v45 = vpop.f32.mrf.mxu0 }
 0x2d9   : > { %3960 = vmatmul.msk.f32.vlgmr.msrb.gmra.mxu0 %vm567_vm2, %v3954_v32 }
 0x2dc   : > { %v1472_v40 = vpop.f32.mrf.mxu3 }
 0x2dd   : > { %v1415_v42 = vpop.f32.mrf.mxu1  ;;  %v1473_v43 = vadd.f32 %v1472_v40, %v1395_v21 }
 0x2de   : > { %v1493_v6 = vadd.f32 %v1492_v45, %v1415_v42 }
 0x2df   : > { %v1585_v47 = vadd.f32 %v1561_v46, %v1473_v43  ;;  %v1627_v41 = vpop.f32.mrf.mxu0 }
 0x2e4   : > { %v1581_v48 = vpop.f32.mrf.mxu3 }
 0x2e5   : > { %v1541_v49 = vpop.f32.mrf.mxu1  ;;  %v1586_v14 = vadd.f32 %v1581_v48, %v1493_v6 }
 0x2e6   : > { %v1584_v7 = vadd.f32 %v1541_v49, %v1453_v38 }
 0x2e8   : > { %v1739_v34 = vpop.f32.mrf.mxu0  ;;  %v1670_v10 = vadd.f32 %v1627_v41, %v1584_v7 }
 0x2ec   : > { %v1719_v51 = vpop.f32.mrf.mxu3  ;;  %v1667_v53 = vpop.f32.mrf.mxu2 }
 0x2ed   : > { %v1647_v39 = vpop.f32.mrf.mxu1  ;;  %v1762_v12 = vadd.f32 %v1719_v51, %v1670_v10  ;;  %v1672_v24 = vadd.f32 %v1667_v53, %v1586_v14 }
 0x2ee   : > { %v1671_v15 = vadd.f32 %v1647_v39, %v1585_v47 }
 0x2f0   : > { %v1763_v25 = vadd.f32 %v1739_v34, %v1671_v15 }
 0x2f4   : > { %v1825_v54 = vpop.f32.mrf.mxu3  ;;  %v1805_v57 = vpop.f32.mrf.mxu2 }
 0x2f5   : > { %v1759_v55 = vpop.f32.mrf.mxu1  ;;  %v1848_v17 = vadd.f32 %v1805_v57, %v1762_v12  ;;  %v1849_v50 = vadd.f32 %v1825_v54, %v1763_v25 }
 0x2f6   : > { %v1764_v27 = vadd.f32 %v1759_v55, %v1672_v24 }
 0x2fc   : > { %v1937_v56 = vpop.f32.mrf.mxu3  ;;  %v1917_v36 = vpop.f32.mrf.mxu2 }
 0x2fd   : > { %v1897_v58 = vpop.f32.mrf.mxu1  ;;  %v1941_v32 = vadd.f32 %v1917_v36, %v1849_v50 }
 0x2fe   : > { %v1940_v20 = vadd.f32 %v1897_v58, %v1848_v17 }
 0x304   : > { %v2075_v35 = vpop.f32.mrf.mxu3 }
 0x305   : > { %v2003_v61 = vpop.f32.mrf.mxu1 }
 0x306   : > { %v1845_v59 = vpop.f32.mrf.mxu0  ;;  %v2027_v22 = vadd.f32 %v2003_v61, %v1941_v32 }
 0x307   : > { %v1850_v63 = vadd.f32 %v1845_v59, %v1764_v27 }
 0x309   : > { %v1942_v37 = vadd.f32 %v1937_v56, %v1850_v63 }
 0x30d   : > { %v2181_v0 = vpop.f32.mrf.mxu3  ;;  %v2115_v2 = vpop.f32.mrf.mxu1 }
 0x30e   : > { %v1983_v60 = vpop.f32.mrf.mxu0 }
 0x30f   : > { %v2026_v26 = vadd.f32 %v1983_v60, %v1940_v20 }
 0x311   : > { %v2118_v29 = vadd.f32 %v2075_v35, %v2026_v26 }
 0x314   : > { %v2023_v62 = vpop.f32.mrf.mxu2 }
 0x315   : > { %v2253_v8 = vpop.f32.mrf.mxu1  ;;  %v2028_v42 = vadd.f32 %v2023_v62, %v1942_v37  ;;  %v3961_v37 = vld [vmem:[%s5056_s8 + $0x4] sm:$0xf] }
 0x316   : > { %v2095_v1 = vpop.f32.mrf.mxu0  ;;  %v2293_v4 = vpop.f32.mrf.mxu3 }
 0x317   : > { %v2119_v38 = vadd.f32 %v2095_v1, %v2027_v22  ;;  %v2120_v48 = vadd.f32 %v2115_v2, %v2028_v42 }
 0x319   : > { %v2205_v45 = vadd.f32 %v2181_v0, %v2119_v38 }
 0x31c   : > { %v2161_v3 = vpop.f32.mrf.mxu2 }
 0x31d   : > { %v2359_v18 = vpop.f32.mrf.mxu1  ;;  %v2204_v33 = vadd.f32 %v2161_v3, %v2118_v29 }
 0x31e   : > { %v2201_v5 = vpop.f32.mrf.mxu0 }
 0x31f   : > { %v2431_v11 = vpop.f32.mrf.mxu3  ;;  %v2296_v40 = vadd.f32 %v2253_v8, %v2204_v33  ;;  %v2206_v41 = vadd.f32 %v2201_v5, %v2120_v48  ;;  %v2919_v5 = vld [vmem:[%s5059_s11] sm:$0x7] }
 0x320   : > { %v2921_v12 = vperm.slane %v2919_v5, 0  ;;  %v3676_v33 = vld [vmem:[%s5057_s9] sm:$0xf] }
 0x321   : > { %v2298_v55 = vadd.f32 %v2293_v4, %v2206_v41  ;;  %v2911_v4 = vpop.permute.xlu1 %2910 }
 0x324   : > { %v2273_v9 = vpop.f32.mrf.mxu2 }
 0x325   : > { %v2297_v49 = vadd.f32 %v2273_v9, %v2205_v45 }
 0x326   : > { %v2339_v13 = vpop.f32.mrf.mxu0 }
 0x327   : > { %v2537_v28 = vpop.f32.mrf.mxu3  ;;  %v2471_v21 = vpop.f32.mrf.mxu1  ;;  %v2382_v43 = vadd.f32 %v2339_v13, %v2296_v40  ;;  %v2383_v54 = vadd.f32 %v2359_v18, %v2297_v49 }
 0x329   : > { %v2474_v51 = vadd.f32 %v2431_v11, %v2382_v43  ;;  %v3095_v40 = vpop.permute.xlu1 %3094 }
 0x32c   : > { %v2379_v19 = vpop.f32.mrf.mxu2 }
 0x32d   : > { %v2384_v35 = vadd.f32 %v2379_v19, %v2298_v55 }
 0x32e   : > { %v2451_v30 = vpop.f32.mrf.mxu0 }
 0x32f   : > { %v2475_v34 = vadd.f32 %v2451_v30, %v2383_v54  ;;  %v2476_v62 = vadd.f32 %v2471_v21, %v2384_v35  ;;  %v2923_v30 = vperm.slane %v2919_v5, 2 }
 0x331   : > { %v2561_v61 = vadd.f32 %v2537_v28, %v2475_v34  ;;  %v2922_v28 = vperm.slane %v2919_v5, 1  ;;  %v3995_v5 = vld [vmem:[%s5056_s8 + $0x14] sm:$0xf] }
 0x334   : > { %v2517_v31 = vpop.f32.mrf.mxu2 }
 0x335   : > { %v2649_v46 = vpop.f32.mrf.mxu3  ;;  %v2560_v53 = vadd.f32 %v2517_v31, %v2474_v51 }
 0x336   : > { %v2557_v47 = vpop.f32.mrf.mxu0  ;;  %v2609_v39 = vpop.f32.mrf.mxu1 }
 0x337   : > { %v2652_v56 = vadd.f32 %v2609_v39, %v2560_v53  ;;  %v2562_v2 = vadd.f32 %v2557_v47, %v2476_v62 }
 0x339   : > { %v2654_v14 = vadd.f32 %v2649_v46, %v2562_v2 }
 0x33d   : > { %v2629_v6 = vpop.f32.mrf.mxu2 }
 0x33e   : > { %v2653_v0 = vadd.f32 %v2629_v6, %v2561_v61 }
 0x344   : > { %v2787_v58 = vpop.f32.mrf.mxu3 }
 0x345   : > { %v2735_v57 = vpop.f32.mrf.mxu2 }
 0x346   : > { %v2695_v59 = vpop.f32.mrf.mxu0  ;;  %v2715_v60 = vpop.f32.mrf.mxu1  ;;  %v2740_v19 = vadd.f32 %v2735_v57, %v2654_v14  ;;  %v3974_v57 = vld [vmem:[%s5056_s8 + $0x8] sm:$0xf]  ;;  %v4009_v14 = vld [vmem:[%s5056_s8 + $0x1c] sm:$0xf] }
 0x347   : > { %v2738_v36 = vadd.f32 %v2695_v59, %v2652_v56  ;;  %v2739_v3 = vadd.f32 %v2715_v60, %v2653_v0  ;;  %v3981_v59 = vld [vmem:[%s5056_s8 + $0xc] sm:$0xf]  ;;  %v3988_v0 = vld [vmem:[%s5056_s8 + $0x10] sm:$0xf] }
 0x349   : > { %v2830_v1 = vadd.f32 %v2787_v58, %v2738_v36 }
 0x34d   : > { %v2861_v7 = vpop.f32.mrf.mxu2 }
 0x34e   : > { %v2904_v8 = vadd.f32 %v2861_v7, %v2830_v1  ;;  %v2807_v9 = vpop.f32.mrf.mxu0  ;;  %v2881_v11 = vpop.f32.mrf.mxu3 }
 0x34f   : > { %v2831_v10 = vadd.f32 %v2807_v9, %v2739_v3  ;;  %v2827_v17 = vpop.f32.mrf.mxu1 }
 0x350   : > { %v2913_v13 = vadd.f32 %v2911_v4, %v2904_v8  ;;  %v2832_v25 = vadd.f32 %v2827_v17, %v2740_v19 }
 0x351   : > { %v2905_v15 = vadd.f32 %v2881_v11, %v2831_v10 }
 0x352   : > { %v2916_v18 = vmax.f32 %v2913_v13, 0.0  ;;  %v4002_v13 = vld [vmem:[%s5056_s8 + $0x18] sm:$0xf] }
 0x353   : > { %v2914_v24 = vadd.f32 %v2911_v4, %v2905_v15 }
 0x354   : > { %v4868_v20 = vmul.f32 %v2921_v12, %v2916_v18 }
 0x355   : > { %v2917_v50 = vmax.f32 %v2914_v24, 0.0 }
 0x356   : > { %3180 = vrot.lane.b32.xlu1 %v4868_v20, %s4083_s24  ;;  %3014 = vrot.lane.b32.xlu0 %v4868_v20, %s4080_s16  ;;  %v2901_v26 = vpop.f32.mrf.mxu0 }
 0x357   : > { %2936 = vrot.lane.b32.xlu2 %v4868_v20, %s4081_s26  ;;  %v2906_v27 = vadd.f32 %v2901_v26, %v2832_v25  ;;  %v4876_v32 = vmul.f32 %v2922_v28, %v2917_v50  ;;  %v4016_v28 = vld [vmem:[%s5056_s8 + $0x20] sm:$0xf] }
 0x359   : > { %v2915_v29 = vadd.f32 %v2911_v4, %v2906_v27 }
 0x35b   : > { %v2918_v31 = vmax.f32 %v2915_v29, 0.0 }
 0x35d   : > { %v4878_v63 = vmul.f32 %v2923_v30, %v2918_v31 }
 0x35e   : > { %2938 = vrot.lane.b32.xlu0 %v4876_v32, %s4081_s26 }
 0x35f   : > { %3096 = vrot.lane.b32.xlu2 %v4868_v20, %s4084_s25  ;;  %2940 = vrot.lane.b32.xlu1 %v4878_v63, %s4081_s26 }
 0x366   : > { %3018 = vrot.lane.b32.xlu0 %v4878_v63, %s4080_s16 }
 0x367   : > { %3422 = vrot.lane.b32.xlu2 %v4868_v20, %s4085_s14  ;;  %3343 = vrot.lane.b32.xlu1 %v4075_v52, %s4068_s29 }
 0x36e   : > { %3098 = vrot.lane.b32.xlu0 %v4876_v32, %s4084_s25 }
 0x36f   : > { %3016 = vrot.lane.b32.xlu2 %v4876_v32, %s4080_s16  ;;  %3100 = vrot.lane.b32.xlu1 %v4878_v63, %s4084_s25 }
 0x376   : > { %3508 = vrot.lane.b32.xlu0 %v4868_v20, %s4069_s17 }
 0x377   : > { %3182 = vrot.lane.b32.xlu2 %v4876_v32, %s4083_s24  ;;  %3337 = vrot.lane.b32.xlu1 %v4868_v20, %s4068_s29 }
 0x37e   : > { %3341 = vrot.lane.b32.xlu0 %v4878_v63, %s4068_s29 }
 0x37f   : > { %3184 = vrot.lane.b32.xlu2 %v4878_v63, %s4083_s24  ;;  %3510 = vrot.lane.b32.xlu1 %v4876_v32, %s4069_s17 }
 0x386   : > { %3424 = vrot.lane.b32.xlu0 %v4876_v32, %s4085_s14 }
 0x387   : > { %3339 = vrot.lane.b32.xlu2 %v4876_v32, %s4068_s29  ;;  %3428 = vrot.lane.b32.xlu1 %v4075_v52, %s4085_s14 }
 0x38e   : > { %3426 = vrot.lane.b32.xlu0 %v4878_v63, %s4085_s14 }
 0x38f   : > { %3512 = vrot.lane.b32.xlu2 %v4878_v63, %s4069_s17  ;;  %3599 = vrot.lane.b32.xlu1 %v4075_v52, %s4070_s30 }
 0x396   : > { %3597 = vrot.lane.b32.xlu0 %v4878_v63, %s4070_s30 }
 0x397   : > { %3595 = vrot.lane.b32.xlu2 %v4876_v32, %s4070_s30  ;;  %3679 = vperm.xlu1 %4056, %v3676_v33  }
 0x39e   : > { %3593 = vrot.lane.b32.xlu0 %v4868_v20, %s4070_s30  ;;  %s4026_s30 = smul.u32 12, %s5062_s22 }
 0x39f   : > { %3514 = vrot.lane.b32.xlu2 %v4075_v52, %s4069_s17  ;;  %v2930_v52 = vld [vmem:[%s5056_s8] sm:$0xf] }
 0x3a0   : > { %s430_s13 = scalar_lea.vmem %s5060_s12, %s4026_s30 }
 0x3b1   : > { %v2937_v21 = vpop.permute.xlu2 %2936 }
 0x3b2   : > { %v2942_v22 = vsel %vm2309_vm0, %v4682_v16, %v2937_v21 }
 0x3b3   : > { %3962 = vmatpush.msk.msrb.mxu1 %vm571_vm1, %v2942_v22 }
 0x3b4   : > { %3963 = vmatmul.msk.f32.vlgmr.msrb.gmra.mxu1 %vm567_vm2, %v3961_v37 }
 0x3b9   : > { %v3097_v38 = vpop.permute.xlu2 %3096 }
 0x3ba   : > { %v3103_v39 = vsel %vm3102_vm8, %v3095_v40, %v3097_v38 }
 0x3c1   : > { %v4936_v42 = vpop.permute.xlu2 %3422 }
 0x3c8   : > { %v3015_v43 = vpop.permute.xlu0 %3014  ;;  %v3181_v46 = vpop.permute.xlu1 %3180 }
 0x3c9   : > { %v3020_v16 = vsel %vm2131_vm15, %v4592_v44, %v3015_v43  ;;  %v3017_v45 = vpop.permute.xlu2 %3016  ;;  %v3186_v58 = vsel %vm2665_vm7, %v4828_v23, %v3181_v46 }
 0x3ca   : > { %v3021_v6 = vsel %vm2131_vm15, %v3015_v43, %v3017_v45  ;;  %3968 = vmatpush.msk.msra.mxu0 %vm571_vm1, %v3020_v16 }
 0x3cb   : > { %3970 = vmatpush.msk.msra.mxu1 %vm571_vm1, %v3021_v6  ;;  %3969 = vmatmul.msk.f32.vlgmr.msra.gmra.mxu0 %vm567_vm2, %v2930_v52 }
 0x3cc   : > { %3971 = vmatmul.msk.f32.vlgmr.msra.gmra.mxu1 %vm567_vm2, %v2930_v52 }
 0x3d0   : > { %v2939_v47 = vpop.permute.xlu0 %2938 }
 0x3d1   : > { %v2943_v48 = vsel %vm2309_vm0, %v2937_v21, %v2939_v47  ;;  %v3183_v49 = vpop.permute.xlu2 %3182  ;;  %v2941_v51 = vpop.permute.xlu1 %2940 }
 0x3d2   : > { %3964 = vmatpush.msk.msrb.mxu2 %vm571_vm1, %v2943_v48  ;;  %v2944_v44 = vsel %vm2309_vm0, %v2939_v47, %v2941_v51  ;;  %v3187_v41 = vsel %vm2665_vm7, %v3181_v46, %v3183_v49 }
 0x3d3   : > { %3965 = vmatmul.msk.f32.vlgmr.msrb.gmra.mxu2 %vm567_vm2, %v3961_v37  ;;  %3966 = vmatpush.msk.msrb.mxu3 %vm571_vm1, %v2944_v44 }
 0x3d4   : > { %3967 = vmatmul.msk.f32.vlgmr.msrb.gmra.mxu3 %vm567_vm2, %v3961_v37 }
 0x3d5   : > { %3975 = vmatpush.msk.msra.mxu3 %vm571_vm1, %v3103_v39 }
 0x3d7   : > { %3984 = vmatpush.msk.msrb.mxu3 %vm571_vm1, %v3187_v41 }
 0x3d8   : > { %v3019_v53 = vpop.permute.xlu0 %3018 }
 0x3d9   : > { %v3022_v54 = vsel %vm2131_vm15, %v3017_v45, %v3019_v53  ;;  %v3185_v55 = vpop.permute.xlu2 %3184  ;;  %v3344_v34 = vpop.permute.xlu1 %3343 }
 0x3da   : > { %3972 = vmatpush.msk.msra.mxu2 %vm571_vm1, %v3022_v54  ;;  %v3188_v61 = vsel %vm2665_vm7, %v3183_v49, %v3185_v55 }
 0x3db   : > { %3973 = vmatmul.msk.f32.vlgmr.msra.gmra.mxu2 %vm567_vm2, %v2930_v52 }
 0x3dc   : > { %3982 = vmatpush.msk.msrb.mxu2 %vm571_vm1, %v3186_v58  ;;  %3976 = vmatmul.msk.f32.vlgmr.msra.gmra.mxu3 %vm567_vm2, %v3974_v57 }
 0x3dd   : > { %3993 = vmatpush.msk.msra.mxu3 %vm571_vm1, %v4878_v63 }
 0x3de   : > { %3991 = vmatpush.msk.msra.mxu2 %vm571_vm1, %v4876_v32 }
 0x3e0   : > { %v3099_v56 = vpop.permute.xlu0 %3098 }
 0x3e1   : > { %v3104_v35 = vsel %vm3102_vm8, %v3097_v38, %v3099_v56  ;;  %v3101_v23 = vpop.permute.xlu1 %3100  ;;  %v3340_v36 = vpop.permute.xlu2 %3339 }
 0x3e2   : > { %3977 = vmatpush.msk.msrb.mxu0 %vm571_vm1, %v3104_v35  ;;  %v3105_v60 = vsel %vm3102_vm8, %v3099_v56, %v3101_v23 }
 0x3e3   : > { %3978 = vmatmul.msk.f32.vlgmr.msrb.gmra.mxu0 %vm567_vm2, %v3974_v57  ;;  %3983 = vmatmul.msk.f32.vlgmr.msrb.gmra.mxu2 %vm567_vm2, %v3981_v59 }
 0x3e4   : > { %3986 = vmatpush.msk.msra.mxu0 %vm571_vm1, %v3188_v61  ;;  %3979 = vmatpush.msk.msrb.mxu1 %vm571_vm1, %v3105_v60 }
 0x3e5   : > { %3980 = vmatmul.msk.f32.vlgmr.msrb.gmra.mxu1 %vm567_vm2, %v3974_v57  ;;  %3985 = vmatmul.msk.f32.vlgmr.msrb.gmra.mxu3 %vm567_vm2, %v3981_v59 }
 0x3e6   : > { %3989 = vmatpush.msk.msra.mxu1 %vm571_vm1, %v4868_v20 }
 0x3e8   : > { %v3509_v62 = vpop.permute.xlu0 %3508 }
 0x3e9   : > { %v3338_v1 = vpop.permute.xlu1 %3337  ;;  %v3513_v3 = vpop.permute.xlu2 %3512 }
 0x3ea   : > { %v3345_v2 = vsel %vm563_vm3, %v3338_v1, %v3340_v36 }
 0x3eb   : > { %3987 = vmatmul.msk.f32.vlgmr.msra.gmra.mxu0 %vm567_vm2, %v3981_v59  ;;  %3992 = vmatmul.msk.f32.vlgmr.msra.gmra.mxu2 %vm567_vm2, %v3988_v0 }
 0x3ec   : > { %3996 = vmatpush.msk.msrb.mxu0 %vm571_vm1, %v3345_v2 }
 0x3ed   : > { %3990 = vmatmul.msk.f32.vlgmr.msra.gmra.mxu1 %vm567_vm2, %v3988_v0  ;;  %3994 = vmatmul.msk.f32.vlgmr.msra.gmra.mxu3 %vm567_vm2, %v3988_v0 }
 0x3f0   : > { %v3342_v7 = vpop.permute.xlu0 %3341 }
 0x3f1   : > { %v3346_v4 = vsel %vm563_vm3, %v3340_v36, %v3342_v7  ;;  %v3347_v8 = vsel %vm563_vm3, %v3342_v7, %v3344_v34  ;;  %v3511_v9 = vpop.permute.xlu1 %3510  ;;  %v3596_v11 = vpop.permute.xlu2 %3595 }
 0x3f2   : > { %3998 = vmatpush.msk.msrb.mxu1 %vm571_vm1, %v3346_v4  ;;  %4000 = vmatpush.msk.msrb.mxu2 %vm571_vm1, %v3347_v8  ;;  %v3516_v10 = vsel %vm803_vm4, %v3509_v62, %v3511_v9  ;;  %v3517_v17 = vsel %vm803_vm4, %v3511_v9, %v3513_v3 }
 0x3f3   : > { %3997 = vmatmul.msk.f32.vlgmr.msrb.gmra.mxu0 %vm567_vm2, %v3995_v5  ;;  %4001 = vmatmul.msk.f32.vlgmr.msrb.gmra.mxu2 %vm567_vm2, %v3995_v5 }
 0x3f4   : > { %4010 = vmatpush.msk.msra.mxu2 %vm571_vm1, %v3516_v10 }
 0x3f5   : > { %3999 = vmatmul.msk.f32.vlgmr.msrb.gmra.mxu1 %vm567_vm2, %v3995_v5 }
 0x3f8   : > { %v3425_v12 = vpop.permute.xlu0 %3424 }
 0x3f9   : > { %v3431_v15 = vsel %vm3430_vm9, %v4936_v42, %v3425_v12  ;;  %v3429_v18 = vpop.permute.xlu1 %3428  ;;  %v3515_v19 = vpop.permute.xlu2 %3514 }
 0x3fa   : > { %4003 = vmatpush.msk.msrb.mxu3 %vm571_vm1, %v3431_v15  ;;  %v3518_v26 = vsel %vm803_vm4, %v3513_v3, %v3515_v19 }
 0x3fb   : > { %4004 = vmatmul.msk.f32.vlgmr.msrb.gmra.mxu3 %vm567_vm2, %v4002_v13  ;;  %4011 = vmatmul.msk.f32.vlgmr.msra.gmra.mxu2 %vm567_vm2, %v4009_v14 }
 0x3fc   : > { %4012 = vmatpush.msk.msra.mxu3 %vm571_vm1, %v3517_v17 }
 0x400   : > { %v3427_v20 = vpop.permute.xlu0 %3426 }
 0x401   : > { %v3432_v24 = vsel %vm3430_vm9, %v3425_v12, %v3427_v20  ;;  %v3433_v25 = vsel %vm3430_vm9, %v3427_v20, %v3429_v18  ;;  %v3600_v27 = vpop.permute.xlu1 %3599 }
 0x402   : > { %4005 = vmatpush.msk.msra.mxu0 %vm571_vm1, %v3432_v24  ;;  %4007 = vmatpush.msk.msra.mxu1 %vm571_vm1, %v3433_v25 }
 0x403   : > { %4006 = vmatmul.msk.f32.vlgmr.msra.gmra.mxu0 %vm567_vm2, %v4002_v13  ;;  %4008 = vmatmul.msk.f32.vlgmr.msra.gmra.mxu1 %vm567_vm2, %v4002_v13 }
 0x404   : > { %4013 = vmatmul.msk.f32.vlgmr.msra.gmra.mxu3 %vm567_vm2, %v4009_v14  ;;  %4014 = vmatpush.msk.msrb.mxu0 %vm571_vm1, %v3518_v26 }
 0x408   : > { %v3598_v50 = vpop.permute.xlu0 %3597 }
 0x409   : > { %v3602_v29 = vsel %vm889_vm6, %v3596_v11, %v3598_v50  ;;  %v3603_v30 = vsel %vm889_vm6, %v3598_v50, %v3600_v27 }
 0x40a   : > { %4019 = vmatpush.msk.msrb.mxu2 %vm571_vm1, %v3602_v29  ;;  %4021 = vmatpush.msk.msrb.mxu3 %vm571_vm1, %v3603_v30 }
 0x40b   : > { %4015 = vmatmul.msk.f32.vlgmr.msrb.gmra.mxu0 %vm567_vm2, %v4009_v14  ;;  %4020 = vmatmul.msk.f32.vlgmr.msrb.gmra.mxu2 %vm567_vm2, %v4016_v28  ;;  %v3680_v14 = vpop.permute.xlu1 %3679 }
 0x40c   : > { %4022 = vmatmul.msk.f32.vlgmr.msrb.gmra.mxu3 %vm567_vm2, %v4016_v28 }
 0x410   : > { %v3594_v31 = vpop.permute.xlu0 %3593 }
 0x411   : > { %v3601_v32 = vsel %vm889_vm6, %v3594_v31, %v3596_v11 }
 0x412   : > { %4017 = vmatpush.msk.msrb.mxu1 %vm571_vm1, %v3601_v32 }
 0x413   : > { %4018 = vmatmul.msk.f32.vlgmr.msrb.gmra.mxu1 %vm567_vm2, %v4016_v28 }
 0x431   : > { %v2971_v33 = vpop.f32.mrf.mxu1 }
 0x448   : > { %v3049_v22 = vpop.f32.mrf.mxu0 }
 0x449   : > { %v3069_v38 = vpop.f32.mrf.mxu1  ;;  %v3050_v44 = vadd.f32 %v3049_v22, %v2971_v33 }
 0x456   : > { %v2991_v63 = vpop.f32.mrf.mxu2 }
 0x457   : > { %v3011_v21 = vpop.f32.mrf.mxu3  ;;  %v3070_v39 = vadd.f32 %v3069_v38, %v2991_v63 }
 0x45e   : > { %v3089_v37 = vpop.f32.mrf.mxu2 }
 0x45f   : > { %v3132_v40 = vpop.f32.mrf.mxu3  ;;  %v3090_v41 = vadd.f32 %v3089_v37, %v3011_v21 }
 0x460   : > { %v3152_v42 = vpop.f32.mrf.mxu0  ;;  %v3175_v55 = vadd.f32 %v3132_v40, %v3050_v44 }
 0x461   : > { %v3176_v34 = vadd.f32 %v3152_v42, %v3070_v39 }
 0x462   : > { %v3172_v52 = vpop.f32.mrf.mxu1 }
 0x463   : > { %v3177_v57 = vadd.f32 %v3172_v52, %v3090_v41 }
 0x466   : > { %v3215_v43 = vpop.f32.mrf.mxu2 }
 0x467   : > { %v3258_v58 = vadd.f32 %v3215_v43, %v3175_v55 }
 0x468   : > { %v3235_v16 = vpop.f32.mrf.mxu3  ;;  %v3255_v45 = vpop.f32.mrf.mxu0 }
 0x469   : > { %v3259_v56 = vadd.f32 %v3235_v16, %v3176_v34  ;;  %v3260_v59 = vadd.f32 %v3255_v45, %v3177_v57 }
 0x46a   : > { %v3289_v6 = vpop.f32.mrf.mxu1 }
 0x46b   : > { %v3332_v23 = vadd.f32 %v3289_v6, %v3258_v58 }
 0x46e   : > { %v3309_v46 = vpop.f32.mrf.mxu2 }
 0x46f   : > { %v3333_v36 = vadd.f32 %v3309_v46, %v3259_v56 }
 0x470   : > { %v3329_v47 = vpop.f32.mrf.mxu3  ;;  %v3374_v48 = vpop.f32.mrf.mxu0 }
 0x471   : > { %v3334_v61 = vadd.f32 %v3329_v47, %v3260_v59  ;;  %v3417_v0 = vadd.f32 %v3374_v48, %v3332_v23 }
 0x472   : > { %v3394_v53 = vpop.f32.mrf.mxu1 }
 0x473   : > { %v3418_v1 = vadd.f32 %v3394_v53, %v3333_v36 }
 0x476   : > { %v3414_v49 = vpop.f32.mrf.mxu2 }
 0x477   : > { %v3419_v2 = vadd.f32 %v3414_v49, %v3334_v61 }
 0x47e   : > { %v3460_v51 = vpop.f32.mrf.mxu3  ;;  %v3545_v35 = vpop.f32.mrf.mxu2 }
 0x47f   : > { %v3503_v3 = vadd.f32 %v3460_v51, %v3417_v0 }
 0x480   : > { %v3480_v54 = vpop.f32.mrf.mxu0  ;;  %v3500_v62 = vpop.f32.mrf.mxu1 }
 0x481   : > { %v3504_v7 = vadd.f32 %v3480_v54, %v3418_v1  ;;  %v3505_v4 = vadd.f32 %v3500_v62, %v3419_v2  ;;  %v3588_v11 = vadd.f32 %v3545_v35, %v3503_v3 }
 0x487   : > { %v3565_v60 = vpop.f32.mrf.mxu3 }
 0x488   : > { %v3585_v5 = vpop.f32.mrf.mxu0  ;;  %v3589_v8 = vadd.f32 %v3565_v60, %v3504_v7 }
 0x489   : > { %v3590_v9 = vadd.f32 %v3585_v5, %v3505_v4 }
 0x48e   : > { %v3650_v10 = vpop.f32.mrf.mxu2 }
 0x48f   : > { %v3674_v12 = vadd.f32 %v3650_v10, %v3589_v8  ;;  %v3670_v13 = vpop.f32.mrf.mxu3 }
 0x490   : > { %v3675_v15 = vadd.f32 %v3670_v13, %v3590_v9  ;;  %v3630_v17 = vpop.f32.mrf.mxu1 }
 0x491   : > { %v3683_v18 = vadd.f32 %v3680_v14, %v3674_v12  ;;  %v3673_v19 = vadd.f32 %v3630_v17, %v3588_v11 }
 0x492   : > { %v3684_v20 = vadd.f32 %v3680_v14, %v3675_v15 }
 0x493   : > { %v3686_v24 = vmax.f32 %v3683_v18, 0.0  ;;  %v3682_v25 = vadd.f32 %v3680_v14, %v3673_v19 }
 0x494   : > { %v3687_v26 = vmax.f32 %v3684_v20, 0.0 }
 0x495   : > { %v3690_v27 = vrot.slane %v3686_v24, 4  ;;  %v3685_v50 = vmax.f32 %v3682_v25, 0.0 }
 0x496   : > { %3694 = vst [vmem:[%s430_s13 + $0x8] sm:$0xf] %v3687_v26 }
 0x497   : > { %v3691_v28 = vsel %vm571_vm1, %v3685_v50, %v3690_v27 }
 0x498   : > { %3693 = vst [vmem:[%s430_s13] sm:$0xff] %v3691_v28 }
 0x499 PF: > { %s22_s21 = sadd.s32 1, %s4064_s21  }
 0x49a   : > { %p19_p4 = scmp.ge.s32.totalorder %s22_s21, 4  }
 0x49c   :  { %21 = sbr.rel (!%p19_p4) target bundleno = 1 (0x1), region = 142 }

</bundles_post_ra>
